<compile_context>
chip_gen: v5e
topology: v5e:2x2
jax: 0.10.0
libtpu: 0.0.40
codegen_flags: <defaults>
</compile_context>

<pallas_src>
import functools

import jax
import jax.numpy as jnp
import numpy as np
from jax import lax
from jax.experimental import pallas as pl
from jax.experimental.pallas import tpu as pltpu

# ---------------------------------------------------------------------------
# Model hyper-parameters (small, consistent with the module's __init__)
# ---------------------------------------------------------------------------
INPUT_SIZE = 16
HIDDEN_SIZE = 32
OUTPUT_SIZE = 4
NUM_LAYERS = 2       # kernel below is specialized to 2 stacked LSTM layers
FC1_SIZE = 32
LN_EPS = 1e-5

BATCH = 2
SEQ = 8

# bf16 MXU operands, f32 accumulation (per review; gate math stays f32).
MXU_DTYPE = jnp.bfloat16


def _sigmoid(x):
    # sigmoid(x) == 0.5 * (1 + tanh(x/2)): one EUP transcendental instead of
    # exp + reciprocal.  Exact identity, so module semantics are preserved.
    return 0.5 * jnp.tanh(0.5 * x) + 0.5


# ---------------------------------------------------------------------------
# Pallas kernel: full forward pass (LSTM recurrence + LN + sigmoid + FC head)
# ---------------------------------------------------------------------------
def _lstm_model_kernel(
    x_ref,            # (B, T, D_in)  f32, batch_first, exactly as given
    w_ih0_ref,        # (D_in, 4H)    bf16
    b0_ref,           # (1, 4H)       f32   bias_ih + bias_hh, layer 0
    w_rec_ref,        # (2H, 8H)      bf16  block-diag [[w_hh0, 0], [0, w_hh1]]
    w_ih1_ref,        # (H, 4H)       bf16
    b1_ref,           # (1, 4H)       f32   bias_ih + bias_hh, layer 1
    ln_g_ref,         # (1, H)        f32
    ln_b_ref,         # (1, H)        f32
    fc1_w_ref,        # (H, 32)       bf16
    fc1_b_ref,        # (1, 32)       f32
    fc2_w_ref,        # (32, O)       bf16
    fc2_b_ref,        # (1, O)        f32
    out_ref,          # (B, O)        f32
    *,
    seq_len,
    batch,
):
    T, B = seq_len, batch
    H = w_ih1_ref.shape[0]
    D = x_ref.shape[-1]

    # Hoist all weight reads out of the recurrence.
    w_rec = w_rec_ref[...]          # (2H, 8H)
    w_ih1 = w_ih1_ref[...]          # (H, 4H)

    # ---- Hoisted layer-0 input projection (one MXU call, bias folded in) ----
    # x is batch-major; (B, T, D) -> (B*T, D) is a free leading-dim reshape
    # (no transpose anywhere, in or out of the kernel).
    # pre0 row (b*T + t) holds the layer-0 input gates for (batch b, time t).
    x2 = x_ref[...].reshape(B * T, D).astype(MXU_DTYPE)
    pre0 = (
        jnp.dot(x2, w_ih0_ref[...], preferred_element_type=jnp.float32)
        + b0_ref[...]
    )                                                    # (B*T, 4H) f32

    # Hoisted bias broadcast for layer 1 (keeps broadcast_in_dim off the loop).
    b1_b = jnp.broadcast_to(b1_ref[...], (B, 4 * H))     # (B, 4H)

    def gate_split(gates):
        # PyTorch gate order: [i, f, g, o]
        i = _sigmoid(gates[:, 0 * H:1 * H])
        f = _sigmoid(gates[:, 1 * H:2 * H])
        g = jnp.tanh(gates[:, 2 * H:3 * H])
        o = _sigmoid(gates[:, 3 * H:4 * H])
        return i, f, g, o

    zeros = jnp.zeros((B, H), jnp.float32)
    c0, c1, h1 = zeros, zeros, zeros
    # Packed previous-step hidden state [h0 | h1]: one (B, 2H) bf16 buffer.
    h_pack = jnp.zeros((B, 2 * H), MXU_DTYPE)

    # ---- Fully unrolled time loop (T is a compile-time constant) ----
    for t in range(T):
        # One wide recurrent matmul per step for BOTH layers (block-diagonal
        # W_rec): (B, 2H) @ (2H, 8H).  Depends only on previous-step state, so
        # it issues at the top of the step, off the layer0->layer1 chain.
        rec = jnp.dot(h_pack, w_rec, preferred_element_type=jnp.float32)  # (B, 8H)
        rec0 = rec[:, : 4 * H]          # lane 128 split: vreg boundary, free
        rec1 = rec[:, 4 * H:]

        # Static per-step slice of the hoisted pre0 (rows b*T + t).
        p0_t = jnp.concatenate(
            [pre0[b * T + t: b * T + t + 1, :] for b in range(B)], axis=0
        )                                                # (B, 4H)

        # Layer 0
        gates0 = p0_t + rec0
        i0, f0, g0, o0 = gate_split(gates0)
        c0 = f0 * c0 + i0 * g0
        h0 = o0 * jnp.tanh(c0)

        # (inter-layer dropout is identity in eval mode)

        # Layer 1: only the w_ih1 matmul sits behind h0 on the serial chain.
        gates1 = (
            jnp.dot(h0.astype(MXU_DTYPE), w_ih1,
                    preferred_element_type=jnp.float32)
            + rec1 + b1_b
        )
        i1, f1, g1, o1 = gate_split(gates1)
        c1 = f1 * c1 + i1 * g1
        h1 = o1 * jnp.tanh(c1)

        # Re-pack state for the next step's wide recurrent matmul.
        h_pack = jnp.concatenate([h0, h1], axis=-1).astype(MXU_DTYPE)

    # ---- LayerNorm over the hidden dimension of output[:, -1, :] ----
    mean = jnp.mean(h1, axis=-1, keepdims=True)
    var = jnp.mean((h1 - mean) ** 2, axis=-1, keepdims=True)
    out = (h1 - mean) * lax.rsqrt(var + LN_EPS) * ln_g_ref[...] + ln_b_ref[...]

    out = _sigmoid(out)
    out = jnp.dot(out.astype(MXU_DTYPE), fc1_w_ref[...],
                  preferred_element_type=jnp.float32) + fc1_b_ref[...]
    # TODO(synk): dropout_fc omitted (eval-mode identity); no train-mode RNG dropout.
    out = _sigmoid(out)
    out = jnp.dot(out.astype(MXU_DTYPE), fc2_w_ref[...],
                  preferred_element_type=jnp.float32) + fc2_b_ref[...]

    out_ref[...] = out.astype(out_ref.dtype)


# ---------------------------------------------------------------------------
# Wrapper (no grid, no tiling: whole-array VMEM residence; footprint < 100 KB)
# ---------------------------------------------------------------------------
@jax.jit
def lstm_model_forward(x, kp):
    """x: (B, T, D_in) batch_first, like the PyTorch module."""
    B, T, D = x.shape
    args = (
        x.astype(jnp.float32),
        kp["w_ih0"], kp["b0"],
        kp["w_rec"], kp["w_ih1"], kp["b1"],
        kp["ln_g"], kp["ln_b"],
        kp["fc1_w"], kp["fc1_b"],
        kp["fc2_w"], kp["fc2_b"],
    )
    vmem = pl.BlockSpec(memory_space=pltpu.MemorySpace.VMEM)
    kernel = functools.partial(_lstm_model_kernel, seq_len=T, batch=B)
    return pl.pallas_call(
        kernel,
        out_shape=jax.ShapeDtypeStruct((B, OUTPUT_SIZE), jnp.float32),
        in_specs=[vmem] * len(args),
        out_specs=vmem,
    )(*args)


# ---------------------------------------------------------------------------
# Deterministic parameter init (PyTorch-style uniform(-1/sqrt(fan), 1/sqrt(fan)))
# ---------------------------------------------------------------------------
def init_params(key):
    ks = jax.random.split(key, 12)

    def uni(k, shape, fan):
        bound = 1.0 / np.sqrt(fan)
        return jax.random.uniform(k, shape, jnp.float32, -bound, bound)

    H, D, O, F1 = HIDDEN_SIZE, INPUT_SIZE, OUTPUT_SIZE, FC1_SIZE
    return {
        # PyTorch stores (4H, in); we keep transposed (in, 4H) for row-major dots.
        "w_ih0": uni(ks[0], (4 * H, D), H).T,
        "w_hh0": uni(ks[1], (4 * H, H), H).T,
        "b_ih0": uni(ks[2], (4 * H,), H),
        "b_hh0": uni(ks[3], (4 * H,), H),
        "w_ih1": uni(ks[4], (4 * H, H), H).T,
        "w_hh1": uni(ks[5], (4 * H, H), H).T,
        "b_ih1": uni(ks[6], (4 * H,), H),
        "b_hh1": uni(ks[7], (4 * H,), H),
        "ln_g": jnp.ones((H,), jnp.float32),
        "ln_b": jnp.zeros((H,), jnp.float32),
        "fc1_w": uni(ks[8], (F1, H), H).T,
        "fc1_b": uni(ks[9], (F1,), H),
        "fc2_w": uni(ks[10], (O, F1), F1).T,
        "fc2_b": uni(ks[11], (O,), F1),
    }


def make_kernel_params(p):
    """Kernel-layout params: fused biases, block-diag W_rec, bf16 MXU weights."""
    H = HIDDEN_SIZE
    w_rec = jnp.zeros((2 * H, 8 * H), jnp.float32)
    w_rec = w_rec.at[:H, : 4 * H].set(p["w_hh0"])        # layer-0 recurrent block
    w_rec = w_rec.at[H:, 4 * H:].set(p["w_hh1"])         # layer-1 recurrent block
    return {
        "w_ih0": p["w_ih0"].astype(MXU_DTYPE),
        "b0": (p["b_ih0"] + p["b_hh0"])[None, :],
        "w_rec": w_rec.astype(MXU_DTYPE),
        "w_ih1": p["w_ih1"].astype(MXU_DTYPE),
        "b1": (p["b_ih1"] + p["b_hh1"])[None, :],
        "ln_g": p["ln_g"][None, :],
        "ln_b": p["ln_b"][None, :],
        "fc1_w": p["fc1_w"].astype(MXU_DTYPE),
        "fc1_b": p["fc1_b"][None, :],
        "fc2_w": p["fc2_w"].astype(MXU_DTYPE),
        "fc2_b": p["fc2_b"][None, :],
    }


# ---------------------------------------------------------------------------
# References
# ---------------------------------------------------------------------------
def reference_forward(x, p):
    """Module-semantics reference, pure f32 (matches the PyTorch forward)."""
    B, T, _ = x.shape
    H = HIDDEN_SIZE

    def cell(x_t, h, c, w_ih, w_hh, b_ih, b_hh):
        gates = x_t @ w_ih + h @ w_hh + b_ih + b_hh
        i = jax.nn.sigmoid(gates[:, 0 * H:1 * H])
        f = jax.nn.sigmoid(gates[:, 1 * H:2 * H])
        g = jnp.tanh(gates[:, 2 * H:3 * H])
        o = jax.nn.sigmoid(gates[:, 3 * H:4 * H])
        c = f * c + i * g
        return o * jnp.tanh(c), c

    h0 = c0 = h1 = c1 = jnp.zeros((B, H), jnp.float32)
    for t in range(T):
        h0, c0 = cell(x[:, t, :], h0, c0, p["w_ih0"], p["w_hh0"], p["b_ih0"], p["b_hh0"])
        h1, c1 = cell(h0, h1, c1, p["w_ih1"], p["w_hh1"], p["b_ih1"], p["b_hh1"])

    mean = jnp.mean(h1, axis=-1, keepdims=True)
    var = jnp.mean((h1 - mean) ** 2, axis=-1, keepdims=True)
    out = (h1 - mean) / jnp.sqrt(var + LN_EPS) * p["ln_g"] + p["ln_b"]
    out = jax.nn.sigmoid(out)
    out = out @ p["fc1_w"] + p["fc1_b"]
    out = jax.nn.sigmoid(out)
    out = out @ p["fc2_w"] + p["fc2_b"]
    return out


def forward_matched(x, kp):
    """Plain-JAX mirror of the kernel math (same bf16 casts) for tight checking."""
    B, T, D = x.shape
    H = HIDDEN_SIZE
    x2 = x.reshape(B * T, D).astype(MXU_DTYPE)
    pre0 = jnp.dot(x2, kp["w_ih0"], preferred_element_type=jnp.float32) + kp["b0"]
    b1_b = jnp.broadcast_to(kp["b1"], (B, 4 * H))

    def gate_split(g):
        return (_sigmoid(g[:, :H]), _sigmoid(g[:, H:2 * H]),
                jnp.tanh(g[:, 2 * H:3 * H]), _sigmoid(g[:, 3 * H:]))

    zeros = jnp.zeros((B, H), jnp.float32)
    c0, c1, h1 = zeros, zeros, zeros
    h_pack = jnp.zeros((B, 2 * H), MXU_DTYPE)
    for t in range(T):
        rec = jnp.dot(h_pack, kp["w_rec"], preferred_element_type=jnp.float32)
        p0_t = jnp.concatenate(
            [pre0[b * T + t: b * T + t + 1, :] for b in range(B)], axis=0)
        i0, f0, g0, o0 = gate_split(p0_t + rec[:, : 4 * H])
        c0 = f0 * c0 + i0 * g0
        h0 = o0 * jnp.tanh(c0)
        gates1 = (jnp.dot(h0.astype(MXU_DTYPE), kp["w_ih1"],
                          preferred_element_type=jnp.float32)
                  + rec[:, 4 * H:] + b1_b)
        i1, f1, g1, o1 = gate_split(gates1)
        c1 = f1 * c1 + i1 * g1
        h1 = o1 * jnp.tanh(c1)
        h_pack = jnp.concatenate([h0, h1], axis=-1).astype(MXU_DTYPE)

    mean = jnp.mean(h1, axis=-1, keepdims=True)
    var = jnp.mean((h1 - mean) ** 2, axis=-1, keepdims=True)
    out = (h1 - mean) * lax.rsqrt(var + LN_EPS) * kp["ln_g"] + kp["ln_b"]
    out = _sigmoid(out)
    out = jnp.dot(out.astype(MXU_DTYPE), kp["fc1_w"],
                  preferred_element_type=jnp.float32) + kp["fc1_b"]
    out = _sigmoid(out)
    out = jnp.dot(out.astype(MXU_DTYPE), kp["fc2_w"],
                  preferred_element_type=jnp.float32) + kp["fc2_b"]
    return out


# ---------------------------------------------------------------------------
if __name__ == "__main__":
    key = jax.random.PRNGKey(0)
    k_x, k_p = jax.random.split(key)

    x = jax.random.normal(k_x, (BATCH, SEQ, INPUT_SIZE), jnp.float32)
    params = init_params(k_p)
    kparams = make_kernel_params(params)

    out = jax.block_until_ready(lstm_model_forward(x, kparams))
    assert out.shape == (BATCH, OUTPUT_SIZE), out.shape

    # 1) Kernel vs precision-matched JAX reference (verifies kernel correctness).
    ref_matched = forward_matched(x, kparams)
    np.testing.assert_allclose(np.asarray(out), np.asarray(ref_matched),
                               rtol=2e-3, atol=2e-3)

    # 2) Kernel vs full-f32 module-semantics reference. Tolerance loosened
    #    (per review) because MXU operands are bf16 with f32 accumulation.
    ref_f32 = reference_forward(x, params)
    np.testing.assert_allclose(np.asarray(out), np.asarray(ref_f32),
                               rtol=5e-2, atol=5e-2)

    print("KERNEL_OK")
</pallas_src>

<mosaic_0001>
module attributes {stable_mosaic.version = 11 : i64} {
  func.func @_lstm_model_kernel(%arg0: memref<2x8x16xf32, #tpu.memory_space<vmem>>, %arg1: memref<16x128xbf16, #tpu.memory_space<vmem>>, %arg2: memref<1x128xf32, #tpu.memory_space<vmem>>, %arg3: memref<64x256xbf16, #tpu.memory_space<vmem>>, %arg4: memref<32x128xbf16, #tpu.memory_space<vmem>>, %arg5: memref<1x128xf32, #tpu.memory_space<vmem>>, %arg6: memref<1x32xf32, #tpu.memory_space<vmem>>, %arg7: memref<1x32xf32, #tpu.memory_space<vmem>>, %arg8: memref<32x32xbf16, #tpu.memory_space<vmem>>, %arg9: memref<1x32xf32, #tpu.memory_space<vmem>>, %arg10: memref<32x4xbf16, #tpu.memory_space<vmem>>, %arg11: memref<1x4xf32, #tpu.memory_space<vmem>>, %arg12: memref<2x4xf32, #tpu.memory_space<vmem>>) attributes {dimension_semantics = [], scalar_prefetch = 0 : i64, scratch_operands = 0 : i64, tpu.core_type = #tpu.core_type<tc>} {
    %c0 = arith.constant 0 : index
    %c0_0 = arith.constant 0 : index
    %0 = vector.load %arg3[%c0, %c0_0] : memref<64x256xbf16, #tpu.memory_space<vmem>>, vector<64x256xbf16>
    %c0_1 = arith.constant 0 : index
    %c0_2 = arith.constant 0 : index
    %1 = vector.load %arg4[%c0_1, %c0_2] : memref<32x128xbf16, #tpu.memory_space<vmem>>, vector<32x128xbf16>
    %c0_3 = arith.constant 0 : index
    %c0_4 = arith.constant 0 : index
    %c0_5 = arith.constant 0 : index
    %2 = vector.load %arg0[%c0_3, %c0_4, %c0_5] : memref<2x8x16xf32, #tpu.memory_space<vmem>>, vector<2x8x16xf32>
    %3 = vector.shape_cast %2 : vector<2x8x16xf32> to vector<16x16xf32>
    %4 = arith.truncf %3 : vector<16x16xf32> to vector<16x16xbf16>
    %c0_6 = arith.constant 0 : index
    %c0_7 = arith.constant 0 : index
    %5 = vector.load %arg1[%c0_6, %c0_7] : memref<16x128xbf16, #tpu.memory_space<vmem>>, vector<16x128xbf16>
    %cst = arith.constant dense<0.000000e+00> : vector<16x128xf32>
    %6 = tpu.matmul %4, %5, %cst {dimension_numbers = #tpu.dot_dimension_numbers<[1], [0], [0], [1], [0, 0, 1, 1], [], []>} : vector<16x16xbf16>, vector<16x128xbf16>, vector<16x128xf32> -> vector<16x128xf32>
    %c0_8 = arith.constant 0 : index
    %c0_9 = arith.constant 0 : index
    %7 = vector.load %arg2[%c0_8, %c0_9] : memref<1x128xf32, #tpu.memory_space<vmem>>, vector<1x128xf32>
    %8 = vector.broadcast %7 : vector<1x128xf32> to vector<16x128xf32>
    %9 = arith.addf %6, %8 : vector<16x128xf32>
    %c0_10 = arith.constant 0 : index
    %c0_11 = arith.constant 0 : index
    %10 = vector.load %arg5[%c0_10, %c0_11] : memref<1x128xf32, #tpu.memory_space<vmem>>, vector<1x128xf32>
    %11 = vector.shape_cast %10 : vector<1x128xf32> to vector<1x128xf32>
    %12 = vector.broadcast %11 : vector<1x128xf32> to vector<2x128xf32>
    %cst_12 = arith.constant 0.000000e+00 : f32
    %13 = vector.broadcast %cst_12 : f32 to vector<2x32xf32>
    %cst_13 = arith.constant 0.000000e+00 : bf16
    %14 = vector.broadcast %cst_13 : bf16 to vector<2x64xbf16>
    %cst_14 = arith.constant dense<0.000000e+00> : vector<2x256xf32>
    %15 = tpu.matmul %14, %0, %cst_14 {dimension_numbers = #tpu.dot_dimension_numbers<[1], [0], [0], [1], [0, 0, 1, 1], [], []>} : vector<2x64xbf16>, vector<64x256xbf16>, vector<2x256xf32> -> vector<2x256xf32>
    %16 = vector.extract_strided_slice %15 {offsets = [0, 0], sizes = [2, 128], strides = [1, 1]} : vector<2x256xf32> to vector<2x128xf32>
    %17 = vector.extract_strided_slice %15 {offsets = [0, 128], sizes = [2, 128], strides = [1, 1]} : vector<2x256xf32> to vector<2x128xf32>
    %18 = vector.extract_strided_slice %9 {offsets = [0, 0], sizes = [1, 128], strides = [1, 1]} : vector<16x128xf32> to vector<1x128xf32>
    %19 = vector.extract_strided_slice %9 {offsets = [8, 0], sizes = [1, 128], strides = [1, 1]} : vector<16x128xf32> to vector<1x128xf32>
    %20 = tpu.concatenate %18, %19 in 0 : vector<1x128xf32>, vector<1x128xf32> -> vector<2x128xf32>
    %21 = arith.addf %20, %16 : vector<2x128xf32>
    %22 = vector.extract_strided_slice %21 {offsets = [0, 0], sizes = [2, 32], strides = [1, 1]} : vector<2x128xf32> to vector<2x32xf32>
    %cst_15 = arith.constant 5.000000e-01 : f32
    %23 = vector.broadcast %cst_15 : f32 to vector<2x32xf32>
    %24 = arith.mulf %23, %22 : vector<2x32xf32>
    %25 = math.tanh %24 : vector<2x32xf32>
    %cst_16 = arith.constant 5.000000e-01 : f32
    %26 = vector.broadcast %cst_16 : f32 to vector<2x32xf32>
    %27 = arith.mulf %26, %25 : vector<2x32xf32>
    %cst_17 = arith.constant 5.000000e-01 : f32
    %28 = vector.broadcast %cst_17 : f32 to vector<2x32xf32>
    %29 = arith.addf %27, %28 : vector<2x32xf32>
    %30 = vector.extract_strided_slice %21 {offsets = [0, 32], sizes = [2, 32], strides = [1, 1]} : vector<2x128xf32> to vector<2x32xf32>
    %cst_18 = arith.constant 5.000000e-01 : f32
    %31 = vector.broadcast %cst_18 : f32 to vector<2x32xf32>
    %32 = arith.mulf %31, %30 : vector<2x32xf32>
    %33 = math.tanh %32 : vector<2x32xf32>
    %cst_19 = arith.constant 5.000000e-01 : f32
    %34 = vector.broadcast %cst_19 : f32 to vector<2x32xf32>
    %35 = arith.mulf %34, %33 : vector<2x32xf32>
    %cst_20 = arith.constant 5.000000e-01 : f32
    %36 = vector.broadcast %cst_20 : f32 to vector<2x32xf32>
    %37 = arith.addf %35, %36 : vector<2x32xf32>
    %38 = vector.extract_strided_slice %21 {offsets = [0, 64], sizes = [2, 32], strides = [1, 1]} : vector<2x128xf32> to vector<2x32xf32>
    %39 = math.tanh %38 : vector<2x32xf32>
    %40 = vector.extract_strided_slice %21 {offsets = [0, 96], sizes = [2, 32], strides = [1, 1]} : vector<2x128xf32> to vector<2x32xf32>
    %cst_21 = arith.constant 5.000000e-01 : f32
    %41 = vector.broadcast %cst_21 : f32 to vector<2x32xf32>
    %42 = arith.mulf %41, %40 : vector<2x32xf32>
    %43 = math.tanh %42 : vector<2x32xf32>
    %cst_22 = arith.constant 5.000000e-01 : f32
    %44 = vector.broadcast %cst_22 : f32 to vector<2x32xf32>
    %45 = arith.mulf %44, %43 : vector<2x32xf32>
    %cst_23 = arith.constant 5.000000e-01 : f32
    %46 = vector.broadcast %cst_23 : f32 to vector<2x32xf32>
    %47 = arith.addf %45, %46 : vector<2x32xf32>
    %48 = arith.mulf %37, %13 : vector<2x32xf32>
    %49 = arith.mulf %29, %39 : vector<2x32xf32>
    %50 = arith.addf %48, %49 : vector<2x32xf32>
    %51 = math.tanh %50 : vector<2x32xf32>
    %52 = arith.mulf %47, %51 : vector<2x32xf32>
    %53 = arith.truncf %52 : vector<2x32xf32> to vector<2x32xbf16>
    %cst_24 = arith.constant dense<0.000000e+00> : vector<2x128xf32>
    %54 = tpu.matmul %53, %1, %cst_24 {dimension_numbers = #tpu.dot_dimension_numbers<[1], [0], [0], [1], [0, 0, 1, 1], [], []>} : vector<2x32xbf16>, vector<32x128xbf16>, vector<2x128xf32> -> vector<2x128xf32>
    %55 = arith.addf %54, %17 : vector<2x128xf32>
    %56 = arith.addf %55, %12 : vector<2x128xf32>
    %57 = vector.extract_strided_slice %56 {offsets = [0, 0], sizes = [2, 32], strides = [1, 1]} : vector<2x128xf32> to vector<2x32xf32>
    %cst_25 = arith.constant 5.000000e-01 : f32
    %58 = vector.broadcast %cst_25 : f32 to vector<2x32xf32>
    %59 = arith.mulf %58, %57 : vector<2x32xf32>
    %60 = math.tanh %59 : vector<2x32xf32>
    %cst_26 = arith.constant 5.000000e-01 : f32
    %61 = vector.broadcast %cst_26 : f32 to vector<2x32xf32>
    %62 = arith.mulf %61, %60 : vector<2x32xf32>
    %cst_27 = arith.constant 5.000000e-01 : f32
    %63 = vector.broadcast %cst_27 : f32 to vector<2x32xf32>
    %64 = arith.addf %62, %63 : vector<2x32xf32>
    %65 = vector.extract_strided_slice %56 {offsets = [0, 32], sizes = [2, 32], strides = [1, 1]} : vector<2x128xf32> to vector<2x32xf32>
    %cst_28 = arith.constant 5.000000e-01 : f32
    %66 = vector.broadcast %cst_28 : f32 to vector<2x32xf32>
    %67 = arith.mulf %66, %65 : vector<2x32xf32>
    %68 = math.tanh %67 : vector<2x32xf32>
    %cst_29 = arith.constant 5.000000e-01 : f32
    %69 = vector.broadcast %cst_29 : f32 to vector<2x32xf32>
    %70 = arith.mulf %69, %68 : vector<2x32xf32>
    %cst_30 = arith.constant 5.000000e-01 : f32
    %71 = vector.broadcast %cst_30 : f32 to vector<2x32xf32>
    %72 = arith.addf %70, %71 : vector<2x32xf32>
    %73 = vector.extract_strided_slice %56 {offsets = [0, 64], sizes = [2, 32], strides = [1, 1]} : vector<2x128xf32> to vector<2x32xf32>
    %74 = math.tanh %73 : vector<2x32xf32>
    %75 = vector.extract_strided_slice %56 {offsets = [0, 96], sizes = [2, 32], strides = [1, 1]} : vector<2x128xf32> to vector<2x32xf32>
    %cst_31 = arith.constant 5.000000e-01 : f32
    %76 = vector.broadcast %cst_31 : f32 to vector<2x32xf32>
    %77 = arith.mulf %76, %75 : vector<2x32xf32>
    %78 = math.tanh %77 : vector<2x32xf32>
    %cst_32 = arith.constant 5.000000e-01 : f32
    %79 = vector.broadcast %cst_32 : f32 to vector<2x32xf32>
    %80 = arith.mulf %79, %78 : vector<2x32xf32>
    %cst_33 = arith.constant 5.000000e-01 : f32
    %81 = vector.broadcast %cst_33 : f32 to vector<2x32xf32>
    %82 = arith.addf %80, %81 : vector<2x32xf32>
    %83 = arith.mulf %72, %13 : vector<2x32xf32>
    %84 = arith.mulf %64, %74 : vector<2x32xf32>
    %85 = arith.addf %83, %84 : vector<2x32xf32>
    %86 = math.tanh %85 : vector<2x32xf32>
    %87 = arith.mulf %82, %86 : vector<2x32xf32>
    %88 = tpu.concatenate %52, %87 in 1 : vector<2x32xf32>, vector<2x32xf32> -> vector<2x64xf32>
    %89 = arith.truncf %88 : vector<2x64xf32> to vector<2x64xbf16>
    %cst_34 = arith.constant dense<0.000000e+00> : vector<2x256xf32>
    %90 = tpu.matmul %89, %0, %cst_34 {dimension_numbers = #tpu.dot_dimension_numbers<[1], [0], [0], [1], [0, 0, 1, 1], [], []>} : vector<2x64xbf16>, vector<64x256xbf16>, vector<2x256xf32> -> vector<2x256xf32>
    %91 = vector.extract_strided_slice %90 {offsets = [0, 0], sizes = [2, 128], strides = [1, 1]} : vector<2x256xf32> to vector<2x128xf32>
    %92 = vector.extract_strided_slice %90 {offsets = [0, 128], sizes = [2, 128], strides = [1, 1]} : vector<2x256xf32> to vector<2x128xf32>
    %93 = vector.extract_strided_slice %9 {offsets = [1, 0], sizes = [1, 128], strides = [1, 1]} : vector<16x128xf32> to vector<1x128xf32>
    %94 = vector.extract_strided_slice %9 {offsets = [9, 0], sizes = [1, 128], strides = [1, 1]} : vector<16x128xf32> to vector<1x128xf32>
    %95 = tpu.concatenate %93, %94 in 0 : vector<1x128xf32>, vector<1x128xf32> -> vector<2x128xf32>
    %96 = arith.addf %95, %91 : vector<2x128xf32>
    %97 = vector.extract_strided_slice %96 {offsets = [0, 0], sizes = [2, 32], strides = [1, 1]} : vector<2x128xf32> to vector<2x32xf32>
    %cst_35 = arith.constant 5.000000e-01 : f32
    %98 = vector.broadcast %cst_35 : f32 to vector<2x32xf32>
    %99 = arith.mulf %98, %97 : vector<2x32xf32>
    %100 = math.tanh %99 : vector<2x32xf32>
    %cst_36 = arith.constant 5.000000e-01 : f32
    %101 = vector.broadcast %cst_36 : f32 to vector<2x32xf32>
    %102 = arith.mulf %101, %100 : vector<2x32xf32>
    %cst_37 = arith.constant 5.000000e-01 : f32
    %103 = vector.broadcast %cst_37 : f32 to vector<2x32xf32>
    %104 = arith.addf %102, %103 : vector<2x32xf32>
    %105 = vector.extract_strided_slice %96 {offsets = [0, 32], sizes = [2, 32], strides = [1, 1]} : vector<2x128xf32> to vector<2x32xf32>
    %cst_38 = arith.constant 5.000000e-01 : f32
    %106 = vector.broadcast %cst_38 : f32 to vector<2x32xf32>
    %107 = arith.mulf %106, %105 : vector<2x32xf32>
    %108 = math.tanh %107 : vector<2x32xf32>
    %cst_39 = arith.constant 5.000000e-01 : f32
    %109 = vector.broadcast %cst_39 : f32 to vector<2x32xf32>
    %110 = arith.mulf %109, %108 : vector<2x32xf32>
    %cst_40 = arith.constant 5.000000e-01 : f32
    %111 = vector.broadcast %cst_40 : f32 to vector<2x32xf32>
    %112 = arith.addf %110, %111 : vector<2x32xf32>
    %113 = vector.extract_strided_slice %96 {offsets = [0, 64], sizes = [2, 32], strides = [1, 1]} : vector<2x128xf32> to vector<2x32xf32>
    %114 = math.tanh %113 : vector<2x32xf32>
    %115 = vector.extract_strided_slice %96 {offsets = [0, 96], sizes = [2, 32], strides = [1, 1]} : vector<2x128xf32> to vector<2x32xf32>
    %cst_41 = arith.constant 5.000000e-01 : f32
    %116 = vector.broadcast %cst_41 : f32 to vector<2x32xf32>
    %117 = arith.mulf %116, %115 : vector<2x32xf32>
    %118 = math.tanh %117 : vector<2x32xf32>
    %cst_42 = arith.constant 5.000000e-01 : f32
    %119 = vector.broadcast %cst_42 : f32 to vector<2x32xf32>
    %120 = arith.mulf %119, %118 : vector<2x32xf32>
    %cst_43 = arith.constant 5.000000e-01 : f32
    %121 = vector.broadcast %cst_43 : f32 to vector<2x32xf32>
    %122 = arith.addf %120, %121 : vector<2x32xf32>
    %123 = arith.mulf %112, %50 : vector<2x32xf32>
    %124 = arith.mulf %104, %114 : vector<2x32xf32>
    %125 = arith.addf %123, %124 : vector<2x32xf32>
    %126 = math.tanh %125 : vector<2x32xf32>
    %127 = arith.mulf %122, %126 : vector<2x32xf32>
    %128 = arith.truncf %127 : vector<2x32xf32> to vector<2x32xbf16>
    %cst_44 = arith.constant dense<0.000000e+00> : vector<2x128xf32>
    %129 = tpu.matmul %128, %1, %cst_44 {dimension_numbers = #tpu.dot_dimension_numbers<[1], [0], [0], [1], [0, 0, 1, 1], [], []>} : vector<2x32xbf16>, vector<32x128xbf16>, vector<2x128xf32> -> vector<2x128xf32>
    %130 = arith.addf %129, %92 : vector<2x128xf32>
    %131 = arith.addf %130, %12 : vector<2x128xf32>
    %132 = vector.extract_strided_slice %131 {offsets = [0, 0], sizes = [2, 32], strides = [1, 1]} : vector<2x128xf32> to vector<2x32xf32>
    %cst_45 = arith.constant 5.000000e-01 : f32
    %133 = vector.broadcast %cst_45 : f32 to vector<2x32xf32>
    %134 = arith.mulf %133, %132 : vector<2x32xf32>
    %135 = math.tanh %134 : vector<2x32xf32>
    %cst_46 = arith.constant 5.000000e-01 : f32
    %136 = vector.broadcast %cst_46 : f32 to vector<2x32xf32>
    %137 = arith.mulf %136, %135 : vector<2x32xf32>
    %cst_47 = arith.constant 5.000000e-01 : f32
    %138 = vector.broadcast %cst_47 : f32 to vector<2x32xf32>
    %139 = arith.addf %137, %138 : vector<2x32xf32>
    %140 = vector.extract_strided_slice %131 {offsets = [0, 32], sizes = [2, 32], strides = [1, 1]} : vector<2x128xf32> to vector<2x32xf32>
    %cst_48 = arith.constant 5.000000e-01 : f32
    %141 = vector.broadcast %cst_48 : f32 to vector<2x32xf32>
    %142 = arith.mulf %141, %140 : vector<2x32xf32>
    %143 = math.tanh %142 : vector<2x32xf32>
    %cst_49 = arith.constant 5.000000e-01 : f32
    %144 = vector.broadcast %cst_49 : f32 to vector<2x32xf32>
    %145 = arith.mulf %144, %143 : vector<2x32xf32>
    %cst_50 = arith.constant 5.000000e-01 : f32
    %146 = vector.broadcast %cst_50 : f32 to vector<2x32xf32>
    %147 = arith.addf %145, %146 : vector<2x32xf32>
    %148 = vector.extract_strided_slice %131 {offsets = [0, 64], sizes = [2, 32], strides = [1, 1]} : vector<2x128xf32> to vector<2x32xf32>
    %149 = math.tanh %148 : vector<2x32xf32>
    %150 = vector.extract_strided_slice %131 {offsets = [0, 96], sizes = [2, 32], strides = [1, 1]} : vector<2x128xf32> to vector<2x32xf32>
    %cst_51 = arith.constant 5.000000e-01 : f32
    %151 = vector.broadcast %cst_51 : f32 to vector<2x32xf32>
    %152 = arith.mulf %151, %150 : vector<2x32xf32>
    %153 = math.tanh %152 : vector<2x32xf32>
    %cst_52 = arith.constant 5.000000e-01 : f32
    %154 = vector.broadcast %cst_52 : f32 to vector<2x32xf32>
    %155 = arith.mulf %154, %153 : vector<2x32xf32>
    %cst_53 = arith.constant 5.000000e-01 : f32
    %156 = vector.broadcast %cst_53 : f32 to vector<2x32xf32>
    %157 = arith.addf %155, %156 : vector<2x32xf32>
    %158 = arith.mulf %147, %85 : vector<2x32xf32>
    %159 = arith.mulf %139, %149 : vector<2x32xf32>
    %160 = arith.addf %158, %159 : vector<2x32xf32>
    %161 = math.tanh %160 : vector<2x32xf32>
    %162 = arith.mulf %157, %161 : vector<2x32xf32>
    %163 = tpu.concatenate %127, %162 in 1 : vector<2x32xf32>, vector<2x32xf32> -> vector<2x64xf32>
    %164 = arith.truncf %163 : vector<2x64xf32> to vector<2x64xbf16>
    %cst_54 = arith.constant dense<0.000000e+00> : vector<2x256xf32>
    %165 = tpu.matmul %164, %0, %cst_54 {dimension_numbers = #tpu.dot_dimension_numbers<[1], [0], [0], [1], [0, 0, 1, 1], [], []>} : vector<2x64xbf16>, vector<64x256xbf16>, vector<2x256xf32> -> vector<2x256xf32>
    %166 = vector.extract_strided_slice %165 {offsets = [0, 0], sizes = [2, 128], strides = [1, 1]} : vector<2x256xf32> to vector<2x128xf32>
    %167 = vector.extract_strided_slice %165 {offsets = [0, 128], sizes = [2, 128], strides = [1, 1]} : vector<2x256xf32> to vector<2x128xf32>
    %168 = vector.extract_strided_slice %9 {offsets = [2, 0], sizes = [1, 128], strides = [1, 1]} : vector<16x128xf32> to vector<1x128xf32>
    %169 = vector.extract_strided_slice %9 {offsets = [10, 0], sizes = [1, 128], strides = [1, 1]} : vector<16x128xf32> to vector<1x128xf32>
    %170 = tpu.concatenate %168, %169 in 0 : vector<1x128xf32>, vector<1x128xf32> -> vector<2x128xf32>
    %171 = arith.addf %170, %166 : vector<2x128xf32>
    %172 = vector.extract_strided_slice %171 {offsets = [0, 0], sizes = [2, 32], strides = [1, 1]} : vector<2x128xf32> to vector<2x32xf32>
    %cst_55 = arith.constant 5.000000e-01 : f32
    %173 = vector.broadcast %cst_55 : f32 to vector<2x32xf32>
    %174 = arith.mulf %173, %172 : vector<2x32xf32>
    %175 = math.tanh %174 : vector<2x32xf32>
    %cst_56 = arith.constant 5.000000e-01 : f32
    %176 = vector.broadcast %cst_56 : f32 to vector<2x32xf32>
    %177 = arith.mulf %176, %175 : vector<2x32xf32>
    %cst_57 = arith.constant 5.000000e-01 : f32
    %178 = vector.broadcast %cst_57 : f32 to vector<2x32xf32>
    %179 = arith.addf %177, %178 : vector<2x32xf32>
    %180 = vector.extract_strided_slice %171 {offsets = [0, 32], sizes = [2, 32], strides = [1, 1]} : vector<2x128xf32> to vector<2x32xf32>
    %cst_58 = arith.constant 5.000000e-01 : f32
    %181 = vector.broadcast %cst_58 : f32 to vector<2x32xf32>
    %182 = arith.mulf %181, %180 : vector<2x32xf32>
    %183 = math.tanh %182 : vector<2x32xf32>
    %cst_59 = arith.constant 5.000000e-01 : f32
    %184 = vector.broadcast %cst_59 : f32 to vector<2x32xf32>
    %185 = arith.mulf %184, %183 : vector<2x32xf32>
    %cst_60 = arith.constant 5.000000e-01 : f32
    %186 = vector.broadcast %cst_60 : f32 to vector<2x32xf32>
    %187 = arith.addf %185, %186 : vector<2x32xf32>
    %188 = vector.extract_strided_slice %171 {offsets = [0, 64], sizes = [2, 32], strides = [1, 1]} : vector<2x128xf32> to vector<2x32xf32>
    %189 = math.tanh %188 : vector<2x32xf32>
    %190 = vector.extract_strided_slice %171 {offsets = [0, 96], sizes = [2, 32], strides = [1, 1]} : vector<2x128xf32> to vector<2x32xf32>
    %cst_61 = arith.constant 5.000000e-01 : f32
    %191 = vector.broadcast %cst_61 : f32 to vector<2x32xf32>
    %192 = arith.mulf %191, %190 : vector<2x32xf32>
    %193 = math.tanh %192 : vector<2x32xf32>
    %cst_62 = arith.constant 5.000000e-01 : f32
    %194 = vector.broadcast %cst_62 : f32 to vector<2x32xf32>
    %195 = arith.mulf %194, %193 : vector<2x32xf32>
    %cst_63 = arith.constant 5.000000e-01 : f32
    %196 = vector.broadcast %cst_63 : f32 to vector<2x32xf32>
    %197 = arith.addf %195, %196 : vector<2x32xf32>
    %198 = arith.mulf %187, %125 : vector<2x32xf32>
    %199 = arith.mulf %179, %189 : vector<2x32xf32>
    %200 = arith.addf %198, %199 : vector<2x32xf32>
    %201 = math.tanh %200 : vector<2x32xf32>
    %202 = arith.mulf %197, %201 : vector<2x32xf32>
    %203 = arith.truncf %202 : vector<2x32xf32> to vector<2x32xbf16>
    %cst_64 = arith.constant dense<0.000000e+00> : vector<2x128xf32>
    %204 = tpu.matmul %203, %1, %cst_64 {dimension_numbers = #tpu.dot_dimension_numbers<[1], [0], [0], [1], [0, 0, 1, 1], [], []>} : vector<2x32xbf16>, vector<32x128xbf16>, vector<2x128xf32> -> vector<2x128xf32>
    %205 = arith.addf %204, %167 : vector<2x128xf32>
    %206 = arith.addf %205, %12 : vector<2x128xf32>
    %207 = vector.extract_strided_slice %206 {offsets = [0, 0], sizes = [2, 32], strides = [1, 1]} : vector<2x128xf32> to vector<2x32xf32>
    %cst_65 = arith.constant 5.000000e-01 : f32
    %208 = vector.broadcast %cst_65 : f32 to vector<2x32xf32>
    %209 = arith.mulf %208, %207 : vector<2x32xf32>
    %210 = math.tanh %209 : vector<2x32xf32>
    %cst_66 = arith.constant 5.000000e-01 : f32
    %211 = vector.broadcast %cst_66 : f32 to vector<2x32xf32>
    %212 = arith.mulf %211, %210 : vector<2x32xf32>
    %cst_67 = arith.constant 5.000000e-01 : f32
    %213 = vector.broadcast %cst_67 : f32 to vector<2x32xf32>
    %214 = arith.addf %212, %213 : vector<2x32xf32>
    %215 = vector.extract_strided_slice %206 {offsets = [0, 32], sizes = [2, 32], strides = [1, 1]} : vector<2x128xf32> to vector<2x32xf32>
    %cst_68 = arith.constant 5.000000e-01 : f32
    %216 = vector.broadcast %cst_68 : f32 to vector<2x32xf32>
    %217 = arith.mulf %216, %215 : vector<2x32xf32>
    %218 = math.tanh %217 : vector<2x32xf32>
    %cst_69 = arith.constant 5.000000e-01 : f32
    %219 = vector.broadcast %cst_69 : f32 to vector<2x32xf32>
    %220 = arith.mulf %219, %218 : vector<2x32xf32>
    %cst_70 = arith.constant 5.000000e-01 : f32
    %221 = vector.broadcast %cst_70 : f32 to vector<2x32xf32>
    %222 = arith.addf %220, %221 : vector<2x32xf32>
    %223 = vector.extract_strided_slice %206 {offsets = [0, 64], sizes = [2, 32], strides = [1, 1]} : vector<2x128xf32> to vector<2x32xf32>
    %224 = math.tanh %223 : vector<2x32xf32>
    %225 = vector.extract_strided_slice %206 {offsets = [0, 96], sizes = [2, 32], strides = [1, 1]} : vector<2x128xf32> to vector<2x32xf32>
    %cst_71 = arith.constant 5.000000e-01 : f32
    %226 = vector.broadcast %cst_71 : f32 to vector<2x32xf32>
    %227 = arith.mulf %226, %225 : vector<2x32xf32>
    %228 = math.tanh %227 : vector<2x32xf32>
    %cst_72 = arith.constant 5.000000e-01 : f32
    %229 = vector.broadcast %cst_72 : f32 to vector<2x32xf32>
    %230 = arith.mulf %229, %228 : vector<2x32xf32>
    %cst_73 = arith.constant 5.000000e-01 : f32
    %231 = vector.broadcast %cst_73 : f32 to vector<2x32xf32>
    %232 = arith.addf %230, %231 : vector<2x32xf32>
    %233 = arith.mulf %222, %160 : vector<2x32xf32>
    %234 = arith.mulf %214, %224 : vector<2x32xf32>
    %235 = arith.addf %233, %234 : vector<2x32xf32>
    %236 = math.tanh %235 : vector<2x32xf32>
    %237 = arith.mulf %232, %236 : vector<2x32xf32>
    %238 = tpu.concatenate %202, %237 in 1 : vector<2x32xf32>, vector<2x32xf32> -> vector<2x64xf32>
    %239 = arith.truncf %238 : vector<2x64xf32> to vector<2x64xbf16>
    %cst_74 = arith.constant dense<0.000000e+00> : vector<2x256xf32>
    %240 = tpu.matmul %239, %0, %cst_74 {dimension_numbers = #tpu.dot_dimension_numbers<[1], [0], [0], [1], [0, 0, 1, 1], [], []>} : vector<2x64xbf16>, vector<64x256xbf16>, vector<2x256xf32> -> vector<2x256xf32>
    %241 = vector.extract_strided_slice %240 {offsets = [0, 0], sizes = [2, 128], strides = [1, 1]} : vector<2x256xf32> to vector<2x128xf32>
    %242 = vector.extract_strided_slice %240 {offsets = [0, 128], sizes = [2, 128], strides = [1, 1]} : vector<2x256xf32> to vector<2x128xf32>
    %243 = vector.extract_strided_slice %9 {offsets = [3, 0], sizes = [1, 128], strides = [1, 1]} : vector<16x128xf32> to vector<1x128xf32>
    %244 = vector.extract_strided_slice %9 {offsets = [11, 0], sizes = [1, 128], strides = [1, 1]} : vector<16x128xf32> to vector<1x128xf32>
    %245 = tpu.concatenate %243, %244 in 0 : vector<1x128xf32>, vector<1x128xf32> -> vector<2x128xf32>
    %246 = arith.addf %245, %241 : vector<2x128xf32>
    %247 = vector.extract_strided_slice %246 {offsets = [0, 0], sizes = [2, 32], strides = [1, 1]} : vector<2x128xf32> to vector<2x32xf32>
    %cst_75 = arith.constant 5.000000e-01 : f32
    %248 = vector.broadcast %cst_75 : f32 to vector<2x32xf32>
    %249 = arith.mulf %248, %247 : vector<2x32xf32>
    %250 = math.tanh %249 : vector<2x32xf32>
    %cst_76 = arith.constant 5.000000e-01 : f32
    %251 = vector.broadcast %cst_76 : f32 to vector<2x32xf32>
    %252 = arith.mulf %251, %250 : vector<2x32xf32>
    %cst_77 = arith.constant 5.000000e-01 : f32
    %253 = vector.broadcast %cst_77 : f32 to vector<2x32xf32>
    %254 = arith.addf %252, %253 : vector<2x32xf32>
    %255 = vector.extract_strided_slice %246 {offsets = [0, 32], sizes = [2, 32], strides = [1, 1]} : vector<2x128xf32> to vector<2x32xf32>
    %cst_78 = arith.constant 5.000000e-01 : f32
    %256 = vector.broadcast %cst_78 : f32 to vector<2x32xf32>
    %257 = arith.mulf %256, %255 : vector<2x32xf32>
    %258 = math.tanh %257 : vector<2x32xf32>
    %cst_79 = arith.constant 5.000000e-01 : f32
    %259 = vector.broadcast %cst_79 : f32 to vector<2x32xf32>
    %260 = arith.mulf %259, %258 : vector<2x32xf32>
    %cst_80 = arith.constant 5.000000e-01 : f32
    %261 = vector.broadcast %cst_80 : f32 to vector<2x32xf32>
    %262 = arith.addf %260, %261 : vector<2x32xf32>
    %263 = vector.extract_strided_slice %246 {offsets = [0, 64], sizes = [2, 32], strides = [1, 1]} : vector<2x128xf32> to vector<2x32xf32>
    %264 = math.tanh %263 : vector<2x32xf32>
    %265 = vector.extract_strided_slice %246 {offsets = [0, 96], sizes = [2, 32], strides = [1, 1]} : vector<2x128xf32> to vector<2x32xf32>
    %cst_81 = arith.constant 5.000000e-01 : f32
    %266 = vector.broadcast %cst_81 : f32 to vector<2x32xf32>
    %267 = arith.mulf %266, %265 : vector<2x32xf32>
    %268 = math.tanh %267 : vector<2x32xf32>
    %cst_82 = arith.constant 5.000000e-01 : f32
    %269 = vector.broadcast %cst_82 : f32 to vector<2x32xf32>
    %270 = arith.mulf %269, %268 : vector<2x32xf32>
    %cst_83 = arith.constant 5.000000e-01 : f32
    %271 = vector.broadcast %cst_83 : f32 to vector<2x32xf32>
    %272 = arith.addf %270, %271 : vector<2x32xf32>
    %273 = arith.mulf %262, %200 : vector<2x32xf32>
    %274 = arith.mulf %254, %264 : vector<2x32xf32>
    %275 = arith.addf %273, %274 : vector<2x32xf32>
    %276 = math.tanh %275 : vector<2x32xf32>
    %277 = arith.mulf %272, %276 : vector<2x32xf32>
    %278 = arith.truncf %277 : vector<2x32xf32> to vector<2x32xbf16>
    %cst_84 = arith.constant dense<0.000000e+00> : vector<2x128xf32>
    %279 = tpu.matmul %278, %1, %cst_84 {dimension_numbers = #tpu.dot_dimension_numbers<[1], [0], [0], [1], [0, 0, 1, 1], [], []>} : vector<2x32xbf16>, vector<32x128xbf16>, vector<2x128xf32> -> vector<2x128xf32>
    %280 = arith.addf %279, %242 : vector<2x128xf32>
    %281 = arith.addf %280, %12 : vector<2x128xf32>
    %282 = vector.extract_strided_slice %281 {offsets = [0, 0], sizes = [2, 32], strides = [1, 1]} : vector<2x128xf32> to vector<2x32xf32>
    %cst_85 = arith.constant 5.000000e-01 : f32
    %283 = vector.broadcast %cst_85 : f32 to vector<2x32xf32>
    %284 = arith.mulf %283, %282 : vector<2x32xf32>
    %285 = math.tanh %284 : vector<2x32xf32>
    %cst_86 = arith.constant 5.000000e-01 : f32
    %286 = vector.broadcast %cst_86 : f32 to vector<2x32xf32>
    %287 = arith.mulf %286, %285 : vector<2x32xf32>
    %cst_87 = arith.constant 5.000000e-01 : f32
    %288 = vector.broadcast %cst_87 : f32 to vector<2x32xf32>
    %289 = arith.addf %287, %288 : vector<2x32xf32>
    %290 = vector.extract_strided_slice %281 {offsets = [0, 32], sizes = [2, 32], strides = [1, 1]} : vector<2x128xf32> to vector<2x32xf32>
    %cst_88 = arith.constant 5.000000e-01 : f32
    %291 = vector.broadcast %cst_88 : f32 to vector<2x32xf32>
    %292 = arith.mulf %291, %290 : vector<2x32xf32>
    %293 = math.tanh %292 : vector<2x32xf32>
    %cst_89 = arith.constant 5.000000e-01 : f32
    %294 = vector.broadcast %cst_89 : f32 to vector<2x32xf32>
    %295 = arith.mulf %294, %293 : vector<2x32xf32>
    %cst_90 = arith.constant 5.000000e-01 : f32
    %296 = vector.broadcast %cst_90 : f32 to vector<2x32xf32>
    %297 = arith.addf %295, %296 : vector<2x32xf32>
    %298 = vector.extract_strided_slice %281 {offsets = [0, 64], sizes = [2, 32], strides = [1, 1]} : vector<2x128xf32> to vector<2x32xf32>
    %299 = math.tanh %298 : vector<2x32xf32>
    %300 = vector.extract_strided_slice %281 {offsets = [0, 96], sizes = [2, 32], strides = [1, 1]} : vector<2x128xf32> to vector<2x32xf32>
    %cst_91 = arith.constant 5.000000e-01 : f32
    %301 = vector.broadcast %cst_91 : f32 to vector<2x32xf32>
    %302 = arith.mulf %301, %300 : vector<2x32xf32>
    %303 = math.tanh %302 : vector<2x32xf32>
    %cst_92 = arith.constant 5.000000e-01 : f32
    %304 = vector.broadcast %cst_92 : f32 to vector<2x32xf32>
    %305 = arith.mulf %304, %303 : vector<2x32xf32>
    %cst_93 = arith.constant 5.000000e-01 : f32
    %306 = vector.broadcast %cst_93 : f32 to vector<2x32xf32>
    %307 = arith.addf %305, %306 : vector<2x32xf32>
    %308 = arith.mulf %297, %235 : vector<2x32xf32>
    %309 = arith.mulf %289, %299 : vector<2x32xf32>
    %310 = arith.addf %308, %309 : vector<2x32xf32>
    %311 = math.tanh %310 : vector<2x32xf32>
    %312 = arith.mulf %307, %311 : vector<2x32xf32>
    %313 = tpu.concatenate %277, %312 in 1 : vector<2x32xf32>, vector<2x32xf32> -> vector<2x64xf32>
    %314 = arith.truncf %313 : vector<2x64xf32> to vector<2x64xbf16>
    %cst_94 = arith.constant dense<0.000000e+00> : vector<2x256xf32>
    %315 = tpu.matmul %314, %0, %cst_94 {dimension_numbers = #tpu.dot_dimension_numbers<[1], [0], [0], [1], [0, 0, 1, 1], [], []>} : vector<2x64xbf16>, vector<64x256xbf16>, vector<2x256xf32> -> vector<2x256xf32>
    %316 = vector.extract_strided_slice %315 {offsets = [0, 0], sizes = [2, 128], strides = [1, 1]} : vector<2x256xf32> to vector<2x128xf32>
    %317 = vector.extract_strided_slice %315 {offsets = [0, 128], sizes = [2, 128], strides = [1, 1]} : vector<2x256xf32> to vector<2x128xf32>
    %318 = vector.extract_strided_slice %9 {offsets = [4, 0], sizes = [1, 128], strides = [1, 1]} : vector<16x128xf32> to vector<1x128xf32>
    %319 = vector.extract_strided_slice %9 {offsets = [12, 0], sizes = [1, 128], strides = [1, 1]} : vector<16x128xf32> to vector<1x128xf32>
    %320 = tpu.concatenate %318, %319 in 0 : vector<1x128xf32>, vector<1x128xf32> -> vector<2x128xf32>
    %321 = arith.addf %320, %316 : vector<2x128xf32>
    %322 = vector.extract_strided_slice %321 {offsets = [0, 0], sizes = [2, 32], strides = [1, 1]} : vector<2x128xf32> to vector<2x32xf32>
    %cst_95 = arith.constant 5.000000e-01 : f32
    %323 = vector.broadcast %cst_95 : f32 to vector<2x32xf32>
    %324 = arith.mulf %323, %322 : vector<2x32xf32>
    %325 = math.tanh %324 : vector<2x32xf32>
    %cst_96 = arith.constant 5.000000e-01 : f32
    %326 = vector.broadcast %cst_96 : f32 to vector<2x32xf32>
    %327 = arith.mulf %326, %325 : vector<2x32xf32>
    %cst_97 = arith.constant 5.000000e-01 : f32
    %328 = vector.broadcast %cst_97 : f32 to vector<2x32xf32>
    %329 = arith.addf %327, %328 : vector<2x32xf32>
    %330 = vector.extract_strided_slice %321 {offsets = [0, 32], sizes = [2, 32], strides = [1, 1]} : vector<2x128xf32> to vector<2x32xf32>
    %cst_98 = arith.constant 5.000000e-01 : f32
    %331 = vector.broadcast %cst_98 : f32 to vector<2x32xf32>
    %332 = arith.mulf %331, %330 : vector<2x32xf32>
    %333 = math.tanh %332 : vector<2x32xf32>
    %cst_99 = arith.constant 5.000000e-01 : f32
    %334 = vector.broadcast %cst_99 : f32 to vector<2x32xf32>
    %335 = arith.mulf %334, %333 : vector<2x32xf32>
    %cst_100 = arith.constant 5.000000e-01 : f32
    %336 = vector.broadcast %cst_100 : f32 to vector<2x32xf32>
    %337 = arith.addf %335, %336 : vector<2x32xf32>
    %338 = vector.extract_strided_slice %321 {offsets = [0, 64], sizes = [2, 32], strides = [1, 1]} : vector<2x128xf32> to vector<2x32xf32>
    %339 = math.tanh %338 : vector<2x32xf32>
    %340 = vector.extract_strided_slice %321 {offsets = [0, 96], sizes = [2, 32], strides = [1, 1]} : vector<2x128xf32> to vector<2x32xf32>
    %cst_101 = arith.constant 5.000000e-01 : f32
    %341 = vector.broadcast %cst_101 : f32 to vector<2x32xf32>
    %342 = arith.mulf %341, %340 : vector<2x32xf32>
    %343 = math.tanh %342 : vector<2x32xf32>
    %cst_102 = arith.constant 5.000000e-01 : f32
    %344 = vector.broadcast %cst_102 : f32 to vector<2x32xf32>
    %345 = arith.mulf %344, %343 : vector<2x32xf32>
    %cst_103 = arith.constant 5.000000e-01 : f32
    %346 = vector.broadcast %cst_103 : f32 to vector<2x32xf32>
    %347 = arith.addf %345, %346 : vector<2x32xf32>
    %348 = arith.mulf %337, %275 : vector<2x32xf32>
    %349 = arith.mulf %329, %339 : vector<2x32xf32>
    %350 = arith.addf %348, %349 : vector<2x32xf32>
    %351 = math.tanh %350 : vector<2x32xf32>
    %352 = arith.mulf %347, %351 : vector<2x32xf32>
    %353 = arith.truncf %352 : vector<2x32xf32> to vector<2x32xbf16>
    %cst_104 = arith.constant dense<0.000000e+00> : vector<2x128xf32>
    %354 = tpu.matmul %353, %1, %cst_104 {dimension_numbers = #tpu.dot_dimension_numbers<[1], [0], [0], [1], [0, 0, 1, 1], [], []>} : vector<2x32xbf16>, vector<32x128xbf16>, vector<2x128xf32> -> vector<2x128xf32>
    %355 = arith.addf %354, %317 : vector<2x128xf32>
    %356 = arith.addf %355, %12 : vector<2x128xf32>
    %357 = vector.extract_strided_slice %356 {offsets = [0, 0], sizes = [2, 32], strides = [1, 1]} : vector<2x128xf32> to vector<2x32xf32>
    %cst_105 = arith.constant 5.000000e-01 : f32
    %358 = vector.broadcast %cst_105 : f32 to vector<2x32xf32>
    %359 = arith.mulf %358, %357 : vector<2x32xf32>
    %360 = math.tanh %359 : vector<2x32xf32>
    %cst_106 = arith.constant 5.000000e-01 : f32
    %361 = vector.broadcast %cst_106 : f32 to vector<2x32xf32>
    %362 = arith.mulf %361, %360 : vector<2x32xf32>
    %cst_107 = arith.constant 5.000000e-01 : f32
    %363 = vector.broadcast %cst_107 : f32 to vector<2x32xf32>
    %364 = arith.addf %362, %363 : vector<2x32xf32>
    %365 = vector.extract_strided_slice %356 {offsets = [0, 32], sizes = [2, 32], strides = [1, 1]} : vector<2x128xf32> to vector<2x32xf32>
    %cst_108 = arith.constant 5.000000e-01 : f32
    %366 = vector.broadcast %cst_108 : f32 to vector<2x32xf32>
    %367 = arith.mulf %366, %365 : vector<2x32xf32>
    %368 = math.tanh %367 : vector<2x32xf32>
    %cst_109 = arith.constant 5.000000e-01 : f32
    %369 = vector.broadcast %cst_109 : f32 to vector<2x32xf32>
    %370 = arith.mulf %369, %368 : vector<2x32xf32>
    %cst_110 = arith.constant 5.000000e-01 : f32
    %371 = vector.broadcast %cst_110 : f32 to vector<2x32xf32>
    %372 = arith.addf %370, %371 : vector<2x32xf32>
    %373 = vector.extract_strided_slice %356 {offsets = [0, 64], sizes = [2, 32], strides = [1, 1]} : vector<2x128xf32> to vector<2x32xf32>
    %374 = math.tanh %373 : vector<2x32xf32>
    %375 = vector.extract_strided_slice %356 {offsets = [0, 96], sizes = [2, 32], strides = [1, 1]} : vector<2x128xf32> to vector<2x32xf32>
    %cst_111 = arith.constant 5.000000e-01 : f32
    %376 = vector.broadcast %cst_111 : f32 to vector<2x32xf32>
    %377 = arith.mulf %376, %375 : vector<2x32xf32>
    %378 = math.tanh %377 : vector<2x32xf32>
    %cst_112 = arith.constant 5.000000e-01 : f32
    %379 = vector.broadcast %cst_112 : f32 to vector<2x32xf32>
    %380 = arith.mulf %379, %378 : vector<2x32xf32>
    %cst_113 = arith.constant 5.000000e-01 : f32
    %381 = vector.broadcast %cst_113 : f32 to vector<2x32xf32>
    %382 = arith.addf %380, %381 : vector<2x32xf32>
    %383 = arith.mulf %372, %310 : vector<2x32xf32>
    %384 = arith.mulf %364, %374 : vector<2x32xf32>
    %385 = arith.addf %383, %384 : vector<2x32xf32>
    %386 = math.tanh %385 : vector<2x32xf32>
    %387 = arith.mulf %382, %386 : vector<2x32xf32>
    %388 = tpu.concatenate %352, %387 in 1 : vector<2x32xf32>, vector<2x32xf32> -> vector<2x64xf32>
    %389 = arith.truncf %388 : vector<2x64xf32> to vector<2x64xbf16>
    %cst_114 = arith.constant dense<0.000000e+00> : vector<2x256xf32>
    %390 = tpu.matmul %389, %0, %cst_114 {dimension_numbers = #tpu.dot_dimension_numbers<[1], [0], [0], [1], [0, 0, 1, 1], [], []>} : vector<2x64xbf16>, vector<64x256xbf16>, vector<2x256xf32> -> vector<2x256xf32>
    %391 = vector.extract_strided_slice %390 {offsets = [0, 0], sizes = [2, 128], strides = [1, 1]} : vector<2x256xf32> to vector<2x128xf32>
    %392 = vector.extract_strided_slice %390 {offsets = [0, 128], sizes = [2, 128], strides = [1, 1]} : vector<2x256xf32> to vector<2x128xf32>
    %393 = vector.extract_strided_slice %9 {offsets = [5, 0], sizes = [1, 128], strides = [1, 1]} : vector<16x128xf32> to vector<1x128xf32>
    %394 = vector.extract_strided_slice %9 {offsets = [13, 0], sizes = [1, 128], strides = [1, 1]} : vector<16x128xf32> to vector<1x128xf32>
    %395 = tpu.concatenate %393, %394 in 0 : vector<1x128xf32>, vector<1x128xf32> -> vector<2x128xf32>
    %396 = arith.addf %395, %391 : vector<2x128xf32>
    %397 = vector.extract_strided_slice %396 {offsets = [0, 0], sizes = [2, 32], strides = [1, 1]} : vector<2x128xf32> to vector<2x32xf32>
    %cst_115 = arith.constant 5.000000e-01 : f32
    %398 = vector.broadcast %cst_115 : f32 to vector<2x32xf32>
    %399 = arith.mulf %398, %397 : vector<2x32xf32>
    %400 = math.tanh %399 : vector<2x32xf32>
    %cst_116 = arith.constant 5.000000e-01 : f32
    %401 = vector.broadcast %cst_116 : f32 to vector<2x32xf32>
    %402 = arith.mulf %401, %400 : vector<2x32xf32>
    %cst_117 = arith.constant 5.000000e-01 : f32
    %403 = vector.broadcast %cst_117 : f32 to vector<2x32xf32>
    %404 = arith.addf %402, %403 : vector<2x32xf32>
    %405 = vector.extract_strided_slice %396 {offsets = [0, 32], sizes = [2, 32], strides = [1, 1]} : vector<2x128xf32> to vector<2x32xf32>
    %cst_118 = arith.constant 5.000000e-01 : f32
    %406 = vector.broadcast %cst_118 : f32 to vector<2x32xf32>
    %407 = arith.mulf %406, %405 : vector<2x32xf32>
    %408 = math.tanh %407 : vector<2x32xf32>
    %cst_119 = arith.constant 5.000000e-01 : f32
    %409 = vector.broadcast %cst_119 : f32 to vector<2x32xf32>
    %410 = arith.mulf %409, %408 : vector<2x32xf32>
    %cst_120 = arith.constant 5.000000e-01 : f32
    %411 = vector.broadcast %cst_120 : f32 to vector<2x32xf32>
    %412 = arith.addf %410, %411 : vector<2x32xf32>
    %413 = vector.extract_strided_slice %396 {offsets = [0, 64], sizes = [2, 32], strides = [1, 1]} : vector<2x128xf32> to vector<2x32xf32>
    %414 = math.tanh %413 : vector<2x32xf32>
    %415 = vector.extract_strided_slice %396 {offsets = [0, 96], sizes = [2, 32], strides = [1, 1]} : vector<2x128xf32> to vector<2x32xf32>
    %cst_121 = arith.constant 5.000000e-01 : f32
    %416 = vector.broadcast %cst_121 : f32 to vector<2x32xf32>
    %417 = arith.mulf %416, %415 : vector<2x32xf32>
    %418 = math.tanh %417 : vector<2x32xf32>
    %cst_122 = arith.constant 5.000000e-01 : f32
    %419 = vector.broadcast %cst_122 : f32 to vector<2x32xf32>
    %420 = arith.mulf %419, %418 : vector<2x32xf32>
    %cst_123 = arith.constant 5.000000e-01 : f32
    %421 = vector.broadcast %cst_123 : f32 to vector<2x32xf32>
    %422 = arith.addf %420, %421 : vector<2x32xf32>
    %423 = arith.mulf %412, %350 : vector<2x32xf32>
    %424 = arith.mulf %404, %414 : vector<2x32xf32>
    %425 = arith.addf %423, %424 : vector<2x32xf32>
    %426 = math.tanh %425 : vector<2x32xf32>
    %427 = arith.mulf %422, %426 : vector<2x32xf32>
    %428 = arith.truncf %427 : vector<2x32xf32> to vector<2x32xbf16>
    %cst_124 = arith.constant dense<0.000000e+00> : vector<2x128xf32>
    %429 = tpu.matmul %428, %1, %cst_124 {dimension_numbers = #tpu.dot_dimension_numbers<[1], [0], [0], [1], [0, 0, 1, 1], [], []>} : vector<2x32xbf16>, vector<32x128xbf16>, vector<2x128xf32> -> vector<2x128xf32>
    %430 = arith.addf %429, %392 : vector<2x128xf32>
    %431 = arith.addf %430, %12 : vector<2x128xf32>
    %432 = vector.extract_strided_slice %431 {offsets = [0, 0], sizes = [2, 32], strides = [1, 1]} : vector<2x128xf32> to vector<2x32xf32>
    %cst_125 = arith.constant 5.000000e-01 : f32
    %433 = vector.broadcast %cst_125 : f32 to vector<2x32xf32>
    %434 = arith.mulf %433, %432 : vector<2x32xf32>
    %435 = math.tanh %434 : vector<2x32xf32>
    %cst_126 = arith.constant 5.000000e-01 : f32
    %436 = vector.broadcast %cst_126 : f32 to vector<2x32xf32>
    %437 = arith.mulf %436, %435 : vector<2x32xf32>
    %cst_127 = arith.constant 5.000000e-01 : f32
    %438 = vector.broadcast %cst_127 : f32 to vector<2x32xf32>
    %439 = arith.addf %437, %438 : vector<2x32xf32>
    %440 = vector.extract_strided_slice %431 {offsets = [0, 32], sizes = [2, 32], strides = [1, 1]} : vector<2x128xf32> to vector<2x32xf32>
    %cst_128 = arith.constant 5.000000e-01 : f32
    %441 = vector.broadcast %cst_128 : f32 to vector<2x32xf32>
    %442 = arith.mulf %441, %440 : vector<2x32xf32>
    %443 = math.tanh %442 : vector<2x32xf32>
    %cst_129 = arith.constant 5.000000e-01 : f32
    %444 = vector.broadcast %cst_129 : f32 to vector<2x32xf32>
    %445 = arith.mulf %444, %443 : vector<2x32xf32>
    %cst_130 = arith.constant 5.000000e-01 : f32
    %446 = vector.broadcast %cst_130 : f32 to vector<2x32xf32>
    %447 = arith.addf %445, %446 : vector<2x32xf32>
    %448 = vector.extract_strided_slice %431 {offsets = [0, 64], sizes = [2, 32], strides = [1, 1]} : vector<2x128xf32> to vector<2x32xf32>
    %449 = math.tanh %448 : vector<2x32xf32>
    %450 = vector.extract_strided_slice %431 {offsets = [0, 96], sizes = [2, 32], strides = [1, 1]} : vector<2x128xf32> to vector<2x32xf32>
    %cst_131 = arith.constant 5.000000e-01 : f32
    %451 = vector.broadcast %cst_131 : f32 to vector<2x32xf32>
    %452 = arith.mulf %451, %450 : vector<2x32xf32>
    %453 = math.tanh %452 : vector<2x32xf32>
    %cst_132 = arith.constant 5.000000e-01 : f32
    %454 = vector.broadcast %cst_132 : f32 to vector<2x32xf32>
    %455 = arith.mulf %454, %453 : vector<2x32xf32>
    %cst_133 = arith.constant 5.000000e-01 : f32
    %456 = vector.broadcast %cst_133 : f32 to vector<2x32xf32>
    %457 = arith.addf %455, %456 : vector<2x32xf32>
    %458 = arith.mulf %447, %385 : vector<2x32xf32>
    %459 = arith.mulf %439, %449 : vector<2x32xf32>
    %460 = arith.addf %458, %459 : vector<2x32xf32>
    %461 = math.tanh %460 : vector<2x32xf32>
    %462 = arith.mulf %457, %461 : vector<2x32xf32>
    %463 = tpu.concatenate %427, %462 in 1 : vector<2x32xf32>, vector<2x32xf32> -> vector<2x64xf32>
    %464 = arith.truncf %463 : vector<2x64xf32> to vector<2x64xbf16>
    %cst_134 = arith.constant dense<0.000000e+00> : vector<2x256xf32>
    %465 = tpu.matmul %464, %0, %cst_134 {dimension_numbers = #tpu.dot_dimension_numbers<[1], [0], [0], [1], [0, 0, 1, 1], [], []>} : vector<2x64xbf16>, vector<64x256xbf16>, vector<2x256xf32> -> vector<2x256xf32>
    %466 = vector.extract_strided_slice %465 {offsets = [0, 0], sizes = [2, 128], strides = [1, 1]} : vector<2x256xf32> to vector<2x128xf32>
    %467 = vector.extract_strided_slice %465 {offsets = [0, 128], sizes = [2, 128], strides = [1, 1]} : vector<2x256xf32> to vector<2x128xf32>
    %468 = vector.extract_strided_slice %9 {offsets = [6, 0], sizes = [1, 128], strides = [1, 1]} : vector<16x128xf32> to vector<1x128xf32>
    %469 = vector.extract_strided_slice %9 {offsets = [14, 0], sizes = [1, 128], strides = [1, 1]} : vector<16x128xf32> to vector<1x128xf32>
    %470 = tpu.concatenate %468, %469 in 0 : vector<1x128xf32>, vector<1x128xf32> -> vector<2x128xf32>
    %471 = arith.addf %470, %466 : vector<2x128xf32>
    %472 = vector.extract_strided_slice %471 {offsets = [0, 0], sizes = [2, 32], strides = [1, 1]} : vector<2x128xf32> to vector<2x32xf32>
    %cst_135 = arith.constant 5.000000e-01 : f32
    %473 = vector.broadcast %cst_135 : f32 to vector<2x32xf32>
    %474 = arith.mulf %473, %472 : vector<2x32xf32>
    %475 = math.tanh %474 : vector<2x32xf32>
    %cst_136 = arith.constant 5.000000e-01 : f32
    %476 = vector.broadcast %cst_136 : f32 to vector<2x32xf32>
    %477 = arith.mulf %476, %475 : vector<2x32xf32>
    %cst_137 = arith.constant 5.000000e-01 : f32
    %478 = vector.broadcast %cst_137 : f32 to vector<2x32xf32>
    %479 = arith.addf %477, %478 : vector<2x32xf32>
    %480 = vector.extract_strided_slice %471 {offsets = [0, 32], sizes = [2, 32], strides = [1, 1]} : vector<2x128xf32> to vector<2x32xf32>
    %cst_138 = arith.constant 5.000000e-01 : f32
    %481 = vector.broadcast %cst_138 : f32 to vector<2x32xf32>
    %482 = arith.mulf %481, %480 : vector<2x32xf32>
    %483 = math.tanh %482 : vector<2x32xf32>
    %cst_139 = arith.constant 5.000000e-01 : f32
    %484 = vector.broadcast %cst_139 : f32 to vector<2x32xf32>
    %485 = arith.mulf %484, %483 : vector<2x32xf32>
    %cst_140 = arith.constant 5.000000e-01 : f32
    %486 = vector.broadcast %cst_140 : f32 to vector<2x32xf32>
    %487 = arith.addf %485, %486 : vector<2x32xf32>
    %488 = vector.extract_strided_slice %471 {offsets = [0, 64], sizes = [2, 32], strides = [1, 1]} : vector<2x128xf32> to vector<2x32xf32>
    %489 = math.tanh %488 : vector<2x32xf32>
    %490 = vector.extract_strided_slice %471 {offsets = [0, 96], sizes = [2, 32], strides = [1, 1]} : vector<2x128xf32> to vector<2x32xf32>
    %cst_141 = arith.constant 5.000000e-01 : f32
    %491 = vector.broadcast %cst_141 : f32 to vector<2x32xf32>
    %492 = arith.mulf %491, %490 : vector<2x32xf32>
    %493 = math.tanh %492 : vector<2x32xf32>
    %cst_142 = arith.constant 5.000000e-01 : f32
    %494 = vector.broadcast %cst_142 : f32 to vector<2x32xf32>
    %495 = arith.mulf %494, %493 : vector<2x32xf32>
    %cst_143 = arith.constant 5.000000e-01 : f32
    %496 = vector.broadcast %cst_143 : f32 to vector<2x32xf32>
    %497 = arith.addf %495, %496 : vector<2x32xf32>
    %498 = arith.mulf %487, %425 : vector<2x32xf32>
    %499 = arith.mulf %479, %489 : vector<2x32xf32>
    %500 = arith.addf %498, %499 : vector<2x32xf32>
    %501 = math.tanh %500 : vector<2x32xf32>
    %502 = arith.mulf %497, %501 : vector<2x32xf32>
    %503 = arith.truncf %502 : vector<2x32xf32> to vector<2x32xbf16>
    %cst_144 = arith.constant dense<0.000000e+00> : vector<2x128xf32>
    %504 = tpu.matmul %503, %1, %cst_144 {dimension_numbers = #tpu.dot_dimension_numbers<[1], [0], [0], [1], [0, 0, 1, 1], [], []>} : vector<2x32xbf16>, vector<32x128xbf16>, vector<2x128xf32> -> vector<2x128xf32>
    %505 = arith.addf %504, %467 : vector<2x128xf32>
    %506 = arith.addf %505, %12 : vector<2x128xf32>
    %507 = vector.extract_strided_slice %506 {offsets = [0, 0], sizes = [2, 32], strides = [1, 1]} : vector<2x128xf32> to vector<2x32xf32>
    %cst_145 = arith.constant 5.000000e-01 : f32
    %508 = vector.broadcast %cst_145 : f32 to vector<2x32xf32>
    %509 = arith.mulf %508, %507 : vector<2x32xf32>
    %510 = math.tanh %509 : vector<2x32xf32>
    %cst_146 = arith.constant 5.000000e-01 : f32
    %511 = vector.broadcast %cst_146 : f32 to vector<2x32xf32>
    %512 = arith.mulf %511, %510 : vector<2x32xf32>
    %cst_147 = arith.constant 5.000000e-01 : f32
    %513 = vector.broadcast %cst_147 : f32 to vector<2x32xf32>
    %514 = arith.addf %512, %513 : vector<2x32xf32>
    %515 = vector.extract_strided_slice %506 {offsets = [0, 32], sizes = [2, 32], strides = [1, 1]} : vector<2x128xf32> to vector<2x32xf32>
    %cst_148 = arith.constant 5.000000e-01 : f32
    %516 = vector.broadcast %cst_148 : f32 to vector<2x32xf32>
    %517 = arith.mulf %516, %515 : vector<2x32xf32>
    %518 = math.tanh %517 : vector<2x32xf32>
    %cst_149 = arith.constant 5.000000e-01 : f32
    %519 = vector.broadcast %cst_149 : f32 to vector<2x32xf32>
    %520 = arith.mulf %519, %518 : vector<2x32xf32>
    %cst_150 = arith.constant 5.000000e-01 : f32
    %521 = vector.broadcast %cst_150 : f32 to vector<2x32xf32>
    %522 = arith.addf %520, %521 : vector<2x32xf32>
    %523 = vector.extract_strided_slice %506 {offsets = [0, 64], sizes = [2, 32], strides = [1, 1]} : vector<2x128xf32> to vector<2x32xf32>
    %524 = math.tanh %523 : vector<2x32xf32>
    %525 = vector.extract_strided_slice %506 {offsets = [0, 96], sizes = [2, 32], strides = [1, 1]} : vector<2x128xf32> to vector<2x32xf32>
    %cst_151 = arith.constant 5.000000e-01 : f32
    %526 = vector.broadcast %cst_151 : f32 to vector<2x32xf32>
    %527 = arith.mulf %526, %525 : vector<2x32xf32>
    %528 = math.tanh %527 : vector<2x32xf32>
    %cst_152 = arith.constant 5.000000e-01 : f32
    %529 = vector.broadcast %cst_152 : f32 to vector<2x32xf32>
    %530 = arith.mulf %529, %528 : vector<2x32xf32>
    %cst_153 = arith.constant 5.000000e-01 : f32
    %531 = vector.broadcast %cst_153 : f32 to vector<2x32xf32>
    %532 = arith.addf %530, %531 : vector<2x32xf32>
    %533 = arith.mulf %522, %460 : vector<2x32xf32>
    %534 = arith.mulf %514, %524 : vector<2x32xf32>
    %535 = arith.addf %533, %534 : vector<2x32xf32>
    %536 = math.tanh %535 : vector<2x32xf32>
    %537 = arith.mulf %532, %536 : vector<2x32xf32>
    %538 = tpu.concatenate %502, %537 in 1 : vector<2x32xf32>, vector<2x32xf32> -> vector<2x64xf32>
    %539 = arith.truncf %538 : vector<2x64xf32> to vector<2x64xbf16>
    %cst_154 = arith.constant dense<0.000000e+00> : vector<2x256xf32>
    %540 = tpu.matmul %539, %0, %cst_154 {dimension_numbers = #tpu.dot_dimension_numbers<[1], [0], [0], [1], [0, 0, 1, 1], [], []>} : vector<2x64xbf16>, vector<64x256xbf16>, vector<2x256xf32> -> vector<2x256xf32>
    %541 = vector.extract_strided_slice %540 {offsets = [0, 0], sizes = [2, 128], strides = [1, 1]} : vector<2x256xf32> to vector<2x128xf32>
    %542 = vector.extract_strided_slice %540 {offsets = [0, 128], sizes = [2, 128], strides = [1, 1]} : vector<2x256xf32> to vector<2x128xf32>
    %543 = vector.extract_strided_slice %9 {offsets = [7, 0], sizes = [1, 128], strides = [1, 1]} : vector<16x128xf32> to vector<1x128xf32>
    %544 = vector.extract_strided_slice %9 {offsets = [15, 0], sizes = [1, 128], strides = [1, 1]} : vector<16x128xf32> to vector<1x128xf32>
    %545 = tpu.concatenate %543, %544 in 0 : vector<1x128xf32>, vector<1x128xf32> -> vector<2x128xf32>
    %546 = arith.addf %545, %541 : vector<2x128xf32>
    %547 = vector.extract_strided_slice %546 {offsets = [0, 0], sizes = [2, 32], strides = [1, 1]} : vector<2x128xf32> to vector<2x32xf32>
    %cst_155 = arith.constant 5.000000e-01 : f32
    %548 = vector.broadcast %cst_155 : f32 to vector<2x32xf32>
    %549 = arith.mulf %548, %547 : vector<2x32xf32>
    %550 = math.tanh %549 : vector<2x32xf32>
    %cst_156 = arith.constant 5.000000e-01 : f32
    %551 = vector.broadcast %cst_156 : f32 to vector<2x32xf32>
    %552 = arith.mulf %551, %550 : vector<2x32xf32>
    %cst_157 = arith.constant 5.000000e-01 : f32
    %553 = vector.broadcast %cst_157 : f32 to vector<2x32xf32>
    %554 = arith.addf %552, %553 : vector<2x32xf32>
    %555 = vector.extract_strided_slice %546 {offsets = [0, 32], sizes = [2, 32], strides = [1, 1]} : vector<2x128xf32> to vector<2x32xf32>
    %cst_158 = arith.constant 5.000000e-01 : f32
    %556 = vector.broadcast %cst_158 : f32 to vector<2x32xf32>
    %557 = arith.mulf %556, %555 : vector<2x32xf32>
    %558 = math.tanh %557 : vector<2x32xf32>
    %cst_159 = arith.constant 5.000000e-01 : f32
    %559 = vector.broadcast %cst_159 : f32 to vector<2x32xf32>
    %560 = arith.mulf %559, %558 : vector<2x32xf32>
    %cst_160 = arith.constant 5.000000e-01 : f32
    %561 = vector.broadcast %cst_160 : f32 to vector<2x32xf32>
    %562 = arith.addf %560, %561 : vector<2x32xf32>
    %563 = vector.extract_strided_slice %546 {offsets = [0, 64], sizes = [2, 32], strides = [1, 1]} : vector<2x128xf32> to vector<2x32xf32>
    %564 = math.tanh %563 : vector<2x32xf32>
    %565 = vector.extract_strided_slice %546 {offsets = [0, 96], sizes = [2, 32], strides = [1, 1]} : vector<2x128xf32> to vector<2x32xf32>
    %cst_161 = arith.constant 5.000000e-01 : f32
    %566 = vector.broadcast %cst_161 : f32 to vector<2x32xf32>
    %567 = arith.mulf %566, %565 : vector<2x32xf32>
    %568 = math.tanh %567 : vector<2x32xf32>
    %cst_162 = arith.constant 5.000000e-01 : f32
    %569 = vector.broadcast %cst_162 : f32 to vector<2x32xf32>
    %570 = arith.mulf %569, %568 : vector<2x32xf32>
    %cst_163 = arith.constant 5.000000e-01 : f32
    %571 = vector.broadcast %cst_163 : f32 to vector<2x32xf32>
    %572 = arith.addf %570, %571 : vector<2x32xf32>
    %573 = arith.mulf %562, %500 : vector<2x32xf32>
    %574 = arith.mulf %554, %564 : vector<2x32xf32>
    %575 = arith.addf %573, %574 : vector<2x32xf32>
    %576 = math.tanh %575 : vector<2x32xf32>
    %577 = arith.mulf %572, %576 : vector<2x32xf32>
    %578 = arith.truncf %577 : vector<2x32xf32> to vector<2x32xbf16>
    %cst_164 = arith.constant dense<0.000000e+00> : vector<2x128xf32>
    %579 = tpu.matmul %578, %1, %cst_164 {dimension_numbers = #tpu.dot_dimension_numbers<[1], [0], [0], [1], [0, 0, 1, 1], [], []>} : vector<2x32xbf16>, vector<32x128xbf16>, vector<2x128xf32> -> vector<2x128xf32>
    %580 = arith.addf %579, %542 : vector<2x128xf32>
    %581 = arith.addf %580, %12 : vector<2x128xf32>
    %582 = vector.extract_strided_slice %581 {offsets = [0, 0], sizes = [2, 32], strides = [1, 1]} : vector<2x128xf32> to vector<2x32xf32>
    %cst_165 = arith.constant 5.000000e-01 : f32
    %583 = vector.broadcast %cst_165 : f32 to vector<2x32xf32>
    %584 = arith.mulf %583, %582 : vector<2x32xf32>
    %585 = math.tanh %584 : vector<2x32xf32>
    %cst_166 = arith.constant 5.000000e-01 : f32
    %586 = vector.broadcast %cst_166 : f32 to vector<2x32xf32>
    %587 = arith.mulf %586, %585 : vector<2x32xf32>
    %cst_167 = arith.constant 5.000000e-01 : f32
    %588 = vector.broadcast %cst_167 : f32 to vector<2x32xf32>
    %589 = arith.addf %587, %588 : vector<2x32xf32>
    %590 = vector.extract_strided_slice %581 {offsets = [0, 32], sizes = [2, 32], strides = [1, 1]} : vector<2x128xf32> to vector<2x32xf32>
    %cst_168 = arith.constant 5.000000e-01 : f32
    %591 = vector.broadcast %cst_168 : f32 to vector<2x32xf32>
    %592 = arith.mulf %591, %590 : vector<2x32xf32>
    %593 = math.tanh %592 : vector<2x32xf32>
    %cst_169 = arith.constant 5.000000e-01 : f32
    %594 = vector.broadcast %cst_169 : f32 to vector<2x32xf32>
    %595 = arith.mulf %594, %593 : vector<2x32xf32>
    %cst_170 = arith.constant 5.000000e-01 : f32
    %596 = vector.broadcast %cst_170 : f32 to vector<2x32xf32>
    %597 = arith.addf %595, %596 : vector<2x32xf32>
    %598 = vector.extract_strided_slice %581 {offsets = [0, 64], sizes = [2, 32], strides = [1, 1]} : vector<2x128xf32> to vector<2x32xf32>
    %599 = math.tanh %598 : vector<2x32xf32>
    %600 = vector.extract_strided_slice %581 {offsets = [0, 96], sizes = [2, 32], strides = [1, 1]} : vector<2x128xf32> to vector<2x32xf32>
    %cst_171 = arith.constant 5.000000e-01 : f32
    %601 = vector.broadcast %cst_171 : f32 to vector<2x32xf32>
    %602 = arith.mulf %601, %600 : vector<2x32xf32>
    %603 = math.tanh %602 : vector<2x32xf32>
    %cst_172 = arith.constant 5.000000e-01 : f32
    %604 = vector.broadcast %cst_172 : f32 to vector<2x32xf32>
    %605 = arith.mulf %604, %603 : vector<2x32xf32>
    %cst_173 = arith.constant 5.000000e-01 : f32
    %606 = vector.broadcast %cst_173 : f32 to vector<2x32xf32>
    %607 = arith.addf %605, %606 : vector<2x32xf32>
    %608 = arith.mulf %597, %535 : vector<2x32xf32>
    %609 = arith.mulf %589, %599 : vector<2x32xf32>
    %610 = arith.addf %608, %609 : vector<2x32xf32>
    %611 = math.tanh %610 : vector<2x32xf32>
    %612 = arith.mulf %607, %611 : vector<2x32xf32>
    %cst_174 = arith.constant dense<0.000000e+00> : vector<2xf32>
    %613 = vector.multi_reduction <add>, %612, %cst_174 [1] : vector<2x32xf32> to vector<2xf32>
    %614 = vector.shape_cast %613 : vector<2xf32> to vector<2x1xf32>
    %cst_175 = arith.constant 3.200000e+01 : f32
    %615 = vector.broadcast %cst_175 : f32 to vector<2x1xf32>
    %616 = arith.divf %614, %615 : vector<2x1xf32>
    %617 = vector.broadcast %616 : vector<2x1xf32> to vector<2x32xf32>
    %618 = arith.subf %612, %617 : vector<2x32xf32>
    %619 = arith.mulf %618, %618 : vector<2x32xf32>
    %cst_176 = arith.constant dense<0.000000e+00> : vector<2xf32>
    %620 = vector.multi_reduction <add>, %619, %cst_176 [1] : vector<2x32xf32> to vector<2xf32>
    %621 = vector.shape_cast %620 : vector<2xf32> to vector<2x1xf32>
    %cst_177 = arith.constant 3.200000e+01 : f32
    %622 = vector.broadcast %cst_177 : f32 to vector<2x1xf32>
    %623 = arith.divf %621, %622 : vector<2x1xf32>
    %624 = vector.broadcast %616 : vector<2x1xf32> to vector<2x32xf32>
    %625 = arith.subf %612, %624 : vector<2x32xf32>
    %cst_178 = arith.constant 9.99999974E-6 : f32
    %626 = vector.broadcast %cst_178 : f32 to vector<2x1xf32>
    %627 = arith.addf %623, %626 : vector<2x1xf32>
    %628 = math.rsqrt %627 : vector<2x1xf32>
    %629 = vector.broadcast %628 : vector<2x1xf32> to vector<2x32xf32>
    %630 = arith.mulf %625, %629 : vector<2x32xf32>
    %c0_179 = arith.constant 0 : index
    %c0_180 = arith.constant 0 : index
    %631 = vector.load %arg6[%c0_179, %c0_180] : memref<1x32xf32, #tpu.memory_space<vmem>>, vector<1x32xf32>
    %632 = vector.broadcast %631 : vector<1x32xf32> to vector<2x32xf32>
    %633 = arith.mulf %630, %632 : vector<2x32xf32>
    %c0_181 = arith.constant 0 : index
    %c0_182 = arith.constant 0 : index
    %634 = vector.load %arg7[%c0_181, %c0_182] : memref<1x32xf32, #tpu.memory_space<vmem>>, vector<1x32xf32>
    %635 = vector.broadcast %634 : vector<1x32xf32> to vector<2x32xf32>
    %636 = arith.addf %633, %635 : vector<2x32xf32>
    %cst_183 = arith.constant 5.000000e-01 : f32
    %637 = vector.broadcast %cst_183 : f32 to vector<2x32xf32>
    %638 = arith.mulf %637, %636 : vector<2x32xf32>
    %639 = math.tanh %638 : vector<2x32xf32>
    %cst_184 = arith.constant 5.000000e-01 : f32
    %640 = vector.broadcast %cst_184 : f32 to vector<2x32xf32>
    %641 = arith.mulf %640, %639 : vector<2x32xf32>
    %cst_185 = arith.constant 5.000000e-01 : f32
    %642 = vector.broadcast %cst_185 : f32 to vector<2x32xf32>
    %643 = arith.addf %641, %642 : vector<2x32xf32>
    %644 = arith.truncf %643 : vector<2x32xf32> to vector<2x32xbf16>
    %c0_186 = arith.constant 0 : index
    %c0_187 = arith.constant 0 : index
    %645 = vector.load %arg8[%c0_186, %c0_187] : memref<32x32xbf16, #tpu.memory_space<vmem>>, vector<32x32xbf16>
    %cst_188 = arith.constant dense<0.000000e+00> : vector<2x32xf32>
    %646 = tpu.matmul %644, %645, %cst_188 {dimension_numbers = #tpu.dot_dimension_numbers<[1], [0], [0], [1], [0, 0, 1, 1], [], []>} : vector<2x32xbf16>, vector<32x32xbf16>, vector<2x32xf32> -> vector<2x32xf32>
    %c0_189 = arith.constant 0 : index
    %c0_190 = arith.constant 0 : index
    %647 = vector.load %arg9[%c0_189, %c0_190] : memref<1x32xf32, #tpu.memory_space<vmem>>, vector<1x32xf32>
    %648 = vector.broadcast %647 : vector<1x32xf32> to vector<2x32xf32>
    %649 = arith.addf %646, %648 : vector<2x32xf32>
    %cst_191 = arith.constant 5.000000e-01 : f32
    %650 = vector.broadcast %cst_191 : f32 to vector<2x32xf32>
    %651 = arith.mulf %650, %649 : vector<2x32xf32>
    %652 = math.tanh %651 : vector<2x32xf32>
    %cst_192 = arith.constant 5.000000e-01 : f32
    %653 = vector.broadcast %cst_192 : f32 to vector<2x32xf32>
    %654 = arith.mulf %653, %652 : vector<2x32xf32>
    %cst_193 = arith.constant 5.000000e-01 : f32
    %655 = vector.broadcast %cst_193 : f32 to vector<2x32xf32>
    %656 = arith.addf %654, %655 : vector<2x32xf32>
    %657 = arith.truncf %656 : vector<2x32xf32> to vector<2x32xbf16>
    %c0_194 = arith.constant 0 : index
    %c0_195 = arith.constant 0 : index
    %658 = vector.load %arg10[%c0_194, %c0_195] : memref<32x4xbf16, #tpu.memory_space<vmem>>, vector<32x4xbf16>
    %cst_196 = arith.constant dense<0.000000e+00> : vector<2x4xf32>
    %659 = tpu.matmul %657, %658, %cst_196 {dimension_numbers = #tpu.dot_dimension_numbers<[1], [0], [0], [1], [0, 0, 1, 1], [], []>} : vector<2x32xbf16>, vector<32x4xbf16>, vector<2x4xf32> -> vector<2x4xf32>
    %c0_197 = arith.constant 0 : index
    %c0_198 = arith.constant 0 : index
    %660 = vector.load %arg11[%c0_197, %c0_198] : memref<1x4xf32, #tpu.memory_space<vmem>>, vector<1x4xf32>
    %661 = vector.broadcast %660 : vector<1x4xf32> to vector<2x4xf32>
    %662 = arith.addf %659, %661 : vector<2x4xf32>
    %c0_199 = arith.constant 0 : index
    %c0_200 = arith.constant 0 : index
    %663 = vector.load %arg12[%c0_199, %c0_200] : memref<2x4xf32, #tpu.memory_space<vmem>>, vector<2x4xf32>
    tpu.vector_store %arg12[%c0_199, %c0_200], %662 {strides = array<i32>} : memref<2x4xf32, #tpu.memory_space<vmem>>, vector<2x4xf32>,
    return
  }
}

</mosaic_0001>

<bundles_post_ra>
// kernel: lstm_model_forward.1
= control target key start
LH: loop header
LB: loop body
LE: loop exit
PB: predicated region body
PF: predicated region fallthrough
CT: control target
= control target key end

     0   :  { %17 = vsyncpa [#allocation3], 0  ;;  %s2081_s0 = inlined_call_operand.vmem [shape: f32[2,8,16], index: 0, kind: input, shape index: {}]   ;;  %s2082_s1 = inlined_call_operand.hbm [shape: bf16[16,128], index: 1, kind: input, shape index: {}]   ;;  %s2083_s2 = inlined_call_operand.vmem [shape: f32[1,128], index: 2, kind: input, shape index: {}]   ;;  %s2084_s3 = inlined_call_operand.hbm [shape: bf16[64,256], index: 3, kind: input, shape index: {}]   ;;  %s2085_s4 = inlined_call_operand.hbm [shape: bf16[32,128], index: 4, kind: input, shape index: {}]   ;;  %s2086_s5 = inlined_call_operand.vmem [shape: f32[1,128], index: 5, kind: input, shape index: {}]   ;;  %s2087_s6 = inlined_call_operand.vmem [shape: f32[1,32], index: 6, kind: input, shape index: {}]   ;;  %s2088_s7 = inlined_call_operand.vmem [shape: f32[1,32], index: 7, kind: input, shape index: {}]   ;;  %s2089_s8 = inlined_call_operand.hbm [shape: bf16[32,32], index: 8, kind: input, shape index: {}]   ;;  %s2090_s9 = inlined_call_operand.hbm [shape: f32[1,32], index: 9, kind: input, shape index: {}]   ;;  %s2091_s10 = inlined_call_operand.vmem [shape: bf16[32,4], index: 10, kind: input, shape index: {}]   ;;  %s2092_s11 = inlined_call_operand.hbm [shape: f32[1,4], index: 11, kind: input, shape index: {}]   ;;  %s2093_s12 = inlined_call_operand.hbm [shape: f32[2,4], index: 12, kind: output, shape index: {}]  }
   0x1   :  { %18 = vsyncpa [#allocation6], 0 }
   0x2   :  { %19 = vsyncpa [#allocation9], 0 }
   0x3   :  { %20 = vsyncpa [#allocation12], 0  ;;  %s43_s23 = sshll.u32 %s2084_s3, 4  ;;  %s44_s23 = int_to_ptr.hbm [resolvable:$true] %s43_s23 }
   0x4   :  { %21 = vsyncpa [#allocation4], 0  ;;  %s1667_s24 = smov [#allocation5]   ;;  %s1668_s26 = smov 128  }
   0x5   :  { %s45_s25 = sshll.u32 %s1667_s24, 4  ;;  %s1669_s27 = smov 8   ;;  %s46_s25 = int_to_ptr.vmem [resolvable:$true] %s45_s25 }
   0x6   :  { %51 = dma.hbm_to_vmem [thread:$0]  %s44_s23, 1024, %s46_s25, [#allocation6], %s1668_s26, %s1668_s26, %s1669_s27  }
   0x7   :  { %s75_s30 = sshll.u32 %s2089_s8, 4  ;;  %s1670_s13 = smov [#allocation8]   ;;  %s76_s30 = int_to_ptr.hbm [resolvable:$true] %s75_s30 }
   0x8   :  { %s77_s14 = sshll.u32 %s1670_s13, 4  ;;  %s28_s17 = sshll.u32 %s2082_s1, 4  ;;  %s78_s14 = int_to_ptr.vmem [resolvable:$true] %s77_s14  ;;  %s29_s17 = int_to_ptr.hbm [resolvable:$true] %s28_s17 }
   0x9   :  { %s1671_s3 = smov 64   ;;  %s1672_s18 = smov 4  }
   0xa   :  { %83 = dma.hbm_to_vmem [thread:$0]  %s76_s30, 256, %s78_s14, [#allocation9], %s1671_s3, %s1671_s3, %s1672_s18  }
   0xb   :  { %s56_s21 = sshll.u32 %s2085_s4, 4  ;;  %s1673_s22 = smov [#allocation2]   ;;  %s57_s21 = int_to_ptr.hbm [resolvable:$true] %s56_s21 }
   0xc   :  { %s30_s8 = sshll.u32 %s1673_s22, 4  ;;  %s1674_s23 = smov [#allocation7]   ;;  %s31_s8 = int_to_ptr.vmem [resolvable:$true] %s30_s8 }
   0xd   :  { %36 = dma.hbm_to_vmem [thread:$0]  %s29_s17, 128, %s31_s8, [#allocation3], %s1671_s3, %s1671_s3, %s1672_s18  }
   0xe   :  { %s58_s1 = sshll.u32 %s1674_s23, 4  ;;  %s89_s26 = sshll.u32 %s2090_s9, 4  ;;  %s59_s1 = int_to_ptr.vmem [resolvable:$true] %s58_s1  ;;  %s90_s26 = int_to_ptr.hbm [resolvable:$true] %s89_s26 }
   0xf   :  { %64 = dma.hbm_to_vmem [thread:$0]  %s57_s21, 256, %s59_s1, [#allocation6], %s1671_s3, %s1671_s3, %s1672_s18  }
  0x10   :  { %s102_s28 = sshll.u32 %s2092_s11, 4  ;;  %s1675_s29 = smov [#allocation10]   ;;  %s103_s28 = int_to_ptr.hbm [resolvable:$true] %s102_s28 }
  0x11   :  { %s91_s30 = sshll.u32 %s1675_s29, 4  ;;  %s1676_s13 = smov [#allocation11]   ;;  %s92_s30 = int_to_ptr.vmem [resolvable:$true] %s91_s30 }
  0x12   :  { %94 = dma.hbm_to_vmem [thread:$0]  %s90_s26, 16, %s92_s30, [#allocation9]  }
  0x13   :  { %s104_s14 = sshll.u32 %s1676_s13, 4  ;;  %s105_s14 = int_to_ptr.vmem [resolvable:$true] %s104_s14 }
  0x14   :  { %107 = dma.hbm_to_vmem [thread:$0]  %s103_s28, 16, %s105_s14, [#allocation12]  }
  0x15   :  { %1657 = dma.done.wait [#allocation3], 128  }
  0x16   :  { %1658 = vsyncadd [#allocation3], 4294967168 }
  0x17   :  { %1659 = dma.done.wait [#allocation6], 1280  }
  0x18   :  { %1660 = vsyncadd [#allocation6], 4294966016 }
  0x19   :  { %1661 = dma.done.wait [#allocation9], 272  }
  0x1a   :  { %1662 = vsyncadd [#allocation9], 4294967024 }
  0x1b   :  { %1663 = dma.done.wait [#allocation12], 16  }
  0x1c   :  { %1664 = vsyncadd [#allocation12], 4294967280  ;;  %v1359_v0 = vld [vmem:[#allocation2] sm:$0xff]  ;;  %v1295_v1 = vld [vmem:[#allocation5 + $0x30] sm:$0xf]  ;;  %vm160_vm0 = vcmask 130048  }
  0x1d   :  { %v1356_v2 = vld [vmem:[#allocation5 + $0x34] sm:$0xf0]  ;;  %v146_v5 = vld [vmem:[%s2081_s0 + $0x8] sm:$0xff]  ;;  %171 = vmatpush.bf16.msra.mxu0 %v1359_v0  ;;  %v1354_v8 = vld [vmem:[#allocation5 + $0x24] sm:$0xf0]  ;;  %v1677_v16 = vmov 0  }
  0x1e   :  { %v1771_v3 = vor.u32 %v1356_v2, %v1295_v1  ;;  %v145_v4 = vld [vmem:[%s2081_s0] sm:$0xff]  ;;  %v1287_v6 = vld [vmem:[#allocation5 + $0x20] sm:$0xf]  ;;  %v1279_v10 = vld [vmem:[#allocation5 + $0x10] sm:$0xf]  ;;  %vm255_vm1 = vcmask 1040384  }
  0x1f   :  { %v147_v7 = vpack.c.bf16 %v146_v5, %v145_v4  ;;  %v1780_v9 = vor.u32 %v1354_v8, %v1287_v6  ;;  %v1352_v11 = vld [vmem:[#allocation5 + $0x14] sm:$0xf0]  ;;  %v1271_v13 = vld [vmem:[#allocation5] sm:$0xf]  ;;  %v1350_v14 = vld [vmem:[#allocation5 + $0x4] sm:$0xf0] }
  0x20   :  { %230 = vmatpush.bf16.msra.mxu1 %v1771_v3  ;;  %v1784_v12 = vor.u32 %v1352_v11, %v1279_v10  ;;  %v1788_v15 = vor.u32 %v1350_v14, %v1271_v13  ;;  %v1379_v18 = vld [vmem:[%s2083_s2] ss:$0 sm:$0xff]  ;;  %s1678_s2 = smov 32   ;;  %v1355_v58 = vld [vmem:[#allocation5 + $0x34] sm:$0xf]  ;;  %v1827_v63 = vld [vmem:[#allocation7 + $0x8] sm:$0xff] }
  0x21   :  { %353 = vmatpush.bf16.msrb.mxu0 %v1771_v3  ;;  %v1297_v59 = vld [vmem:[#allocation5 + $0x38] sm:$0xf0]  ;;  %v1353_v60 = vld [vmem:[#allocation5 + $0x24] sm:$0xf]  ;;  %v1289_v62 = vld [vmem:[#allocation5 + $0x28] sm:$0xf0]  ;;  %306 = vmatpush.bf16.msra.mxu3 %v1827_v63 }
  0x22   :  { %1268 = vmatmul.msk.bf16.vlgmr.msra.gmra.mxu0 %vm160_vm0, %v147_v7  ;;  %v1825_v61 = vor.u32 %v1355_v58, %v1297_v59  ;;  %v1830_v0 = vor.u32 %v1353_v60, %v1289_v62  ;;  %v1351_v1 = vld [vmem:[#allocation5 + $0x14] sm:$0xf]  ;;  %v1281_v2 = vld [vmem:[#allocation5 + $0x18] sm:$0xf0]  ;;  %v1834_v4 = vld [vmem:[#allocation7] sm:$0xff]  ;;  %vm296_vm2 = vcmask 261120  }
  0x23   :  { %v1838_v5 = vor.u32 %v1351_v1, %v1281_v2  ;;  %v1349_v6 = vld [vmem:[#allocation5 + $0x4] sm:$0xf]  ;;  %v1273_v7 = vld [vmem:[#allocation5 + $0x8] sm:$0xf0]  ;;  %vm222_vm3 = vcmask 523264   ;;  %vm1109_vm4 = vcmask 254976  }
  0x24   :  { %231 = vmatpush.bf16.msra.mxu1 %v1780_v9  ;;  %243 = vmatpush.bf16.msra.mxu2 %v1825_v61  ;;  %v1846_v8 = vor.u32 %v1349_v6, %v1273_v7  ;;  %s1680_s20 = smov 96   ;;  %s1681_s1 = smov [#allocation13]   ;;  %vm1242_vm9 = vcmask 25600  }
  0x25   :  { %354 = vmatpush.bf16.msrb.mxu0 %v1780_v9  ;;  %307 = vmatpush.bf16.msra.mxu3 %v1834_v4  ;;  %s1249_s24 = sshll.u32 %s1681_s1, 4  ;;  %s1250_s24 = int_to_ptr.vmem [resolvable:$true] %s1249_s24 }
  0x28   :  { %232 = vmatpush.bf16.msra.mxu1 %v1784_v12  ;;  %244 = vmatpush.bf16.msra.mxu2 %v1830_v0 }
  0x29   :  { %355 = vmatpush.bf16.msrb.mxu0 %v1784_v12  ;;  %366 = vmatpush.bf16.msrb.mxu3 %v1825_v61 }
  0x2c   :  { %233 = vmatpush.bf16.msra.mxu1 %v1788_v15  ;;  %245 = vmatpush.bf16.msra.mxu2 %v1838_v5 }
  0x2d   :  { %356 = vmatpush.bf16.msrb.mxu0 %v1788_v15  ;;  %367 = vmatpush.bf16.msrb.mxu3 %v1830_v0 }
  0x2f   :  { %234 = vmatmul.bf16.vlgmr.msra.gmra.mxu1 %v1677_v16 }
  0x30   :  { %415 = vmatpush.bf16.msrb.mxu1 %v1827_v63  ;;  %246 = vmatpush.bf16.msra.mxu2 %v1846_v8 }
  0x31   :  { %475 = vmatpush.bf16.msra.mxu0 %v1825_v61  ;;  %368 = vmatpush.bf16.msrb.mxu3 %v1838_v5 }
  0x33   :  { %247 = vmatmul.bf16.vlgmr.msra.gmra.mxu2 %v1677_v16 }
  0x34   :  { %416 = vmatpush.bf16.msrb.mxu1 %v1834_v4  ;;  %462 = vmatpush.bf16.msrb.mxu2 %v1771_v3 }
  0x35   :  { %476 = vmatpush.bf16.msra.mxu0 %v1830_v0  ;;  %369 = vmatpush.bf16.msrb.mxu3 %v1846_v8 }
  0x38   :  { %572 = vmatpush.bf16.msra.mxu1 %v1771_v3  ;;  %463 = vmatpush.bf16.msrb.mxu2 %v1780_v9 }
  0x39   :  { %477 = vmatpush.bf16.msra.mxu0 %v1838_v5 }
  0x3c   :  { %573 = vmatpush.bf16.msra.mxu1 %v1780_v9  ;;  %464 = vmatpush.bf16.msrb.mxu2 %v1784_v12 }
  0x3d   :  { %478 = vmatpush.bf16.msra.mxu0 %v1846_v8 }
  0x40   :  { %574 = vmatpush.bf16.msra.mxu1 %v1784_v12  ;;  %465 = vmatpush.bf16.msrb.mxu2 %v1788_v15 }
  0x44   :  { %575 = vmatpush.bf16.msra.mxu1 %v1788_v15  ;;  %585 = vmatpush.bf16.msra.mxu2 %v1825_v61 }
  0x48   :  { %586 = vmatpush.bf16.msra.mxu2 %v1830_v0 }
  0x4c   :  { %587 = vmatpush.bf16.msra.mxu2 %v1838_v5 }
  0x50   :  { %588 = vmatpush.bf16.msra.mxu2 %v1846_v8 }
  0x9f   :  { %v173_v17 = vpop.f32.mrf.mxu0 }
  0xa0   :  { %v174_v19 = vadd.f32 %v1379_v18, %v173_v17 }
  0xa2   :  { %v376_v22 = vrot.slane %v174_v19, 1  ;;  %v484_v23 = vrot.slane %v174_v19, 2  ;;  %v594_v24 = vrot.slane %v174_v19, 3  ;;  %v704_v25 = vrot.slane %v174_v19, 4 }
  0xa3   :  { %v814_v26 = vrot.slane %v174_v19, 5  ;;  %v924_v27 = vrot.slane %v174_v19, 6  ;;  %v1034_v40 = vrot.slane %v174_v19, 7 }
  0xa7   :  { %v175_v20 = vpop.f32.mrf.mxu0 }
  0xa8   :  { %v176_v21 = vadd.f32 %v1379_v18, %v175_v20  ;;  %v1874_v18 = vld [vmem:[%s2086_s5] ss:$0 sm:$0xff] }
  0xaa   :  { %v253_v28 = vrot.slane %v176_v21, 7  ;;  %v1798_v29 = vsel %vm255_vm1, %v376_v22, %v176_v21  ;;  %v486_v30 = vrot.slane %v176_v21, 1  ;;  %v596_v31 = vrot.slane %v176_v21, 2 }
  0xab   :  { %v706_v32 = vrot.slane %v176_v21, 3  ;;  %v816_v33 = vrot.slane %v176_v21, 4  ;;  %v926_v34 = vrot.slane %v176_v21, 5  ;;  %v1036_v35 = vrot.slane %v176_v21, 6 }
  0xac   :  { %v235_v36 = vpop.f32.mrf.mxu1  ;;  %v256_v37 = vsel %vm255_vm1, %v174_v19, %v253_v28  ;;  %v1802_v38 = vsel %vm255_vm1, %v484_v23, %v486_v30  ;;  %v1805_v39 = vsel %vm255_vm1, %v594_v24, %v596_v31 }
  0xad   :  { %v257_v41 = vadd.f32 %v256_v37, %v235_v36  ;;  %v1808_v42 = vsel %vm255_vm1, %v704_v25, %v706_v32  ;;  %v1811_v43 = vsel %vm255_vm1, %v814_v26, %v816_v33  ;;  %v1814_v44 = vsel %vm255_vm1, %v924_v27, %v926_v34 }
  0xae   :  { %v1817_v45 = vsel %vm255_vm1, %v1034_v40, %v1036_v35 }
  0xaf   :  { %1385 = vtanh.f32 %v257_v41  ;;  %v258_v48 = vmul.f32 0.5, %v257_v41 }
  0xb1   :  { %1387 = vtanh.f32 %v258_v48 }
  0xb4   :  { %v237_v46 = vpop.f32.mrf.mxu1 }
  0xb5   :  { %v1386_v47 = vpop.eup %1385 }
  0xb6   :  { %265 = vrot.lane.b32.xlu0 %v1386_v47, %s1671_s3  ;;  %v248_v16 = vpop.f32.mrf.mxu2 }
  0xb7   :  { %v1388_v49 = vpop.eup %1387 }
  0xb8   :  { %v260_v50 = vmul.f32 0.5, %v1388_v49 }
  0xba   :  { %v261_v51 = vadd.f32 0.5, %v260_v50 }
  0xbc   :  { %v263_v54 = vmul.f32 0.0, %v261_v51 }
  0xbe   :  { %v250_v17 = vpop.f32.mrf.mxu2 }
 0x128   :  { %v266_v52 = vpop.permute.xlu0 %265 }
 0x129   :  { %v268_v53 = vmul.f32 %v266_v52, %v261_v51 }
 0x12b   :  { %270 = vrot.lane.b32.xlu0 %v268_v53, %s1678_s2 }
 0x19d   :  { %v271_v55 = vpop.permute.xlu0 %270 }
 0x19e   :  { %v1821_v56 = vadd.f32 %v271_v55, %v263_v54 }
 0x1a0   :  { %1389 = vtanh.f32 %v1821_v56 }
 0x1a6   :  { %v1390_v57 = vpop.eup %1389 }
 0x1a7   :  { %276 = vrot.lane.b32.xlu1 %v1390_v57, %s1671_s3 }
 0x219   :  { %v277_v10 = vpop.permute.xlu1 %276 }
 0x21a   :  { %v279_v11 = vmul.f32 %v277_v10, %v261_v51 }
 0x21c   :  { %v280_v13 = vpack.c.bf16 %v279_v11, %v279_v11 }
 0x21e   :  { %282 = vrot.lane.b32.xlu1 %v280_v13, %s1678_s2 }
 0x226   :  { %337 = vrot.lane.b32.xlu1 %v279_v11, %s1678_s2 }
 0x290   :  { %v283_v14 = vpop.permute.xlu1 %282 }
 0x291   :  { %1309 = vmatmul.msk.bf16.vlgmr.msra.gmra.mxu3 %vm296_vm2, %v283_v14 }
 0x292   :  { %525 = vmatpush.bf16.msra.mxu3 %v1827_v63 }
 0x296   :  { %526 = vmatpush.bf16.msra.mxu3 %v1834_v4 }
 0x298   :  { %v338_v37 = vpop.permute.xlu1 %337 }
 0x314   :  { %v309_v19 = vpop.f32.mrf.mxu3 }
 0x315   :  { %v310_v20 = vadd.f32 %v309_v19, %v248_v16 }
 0x317   :  { %v313_v21 = vadd.f32 %v1874_v18, %v310_v20 }
 0x319   :  { %1391 = vtanh.f32 %v313_v21  ;;  %v314_v24 = vmul.f32 0.5, %v313_v21 }
 0x31b   :  { %1393 = vtanh.f32 %v314_v24 }
 0x31c   :  { %v311_v22 = vpop.f32.mrf.mxu3 }
 0x31f   :  { %v1392_v23 = vpop.eup %1391 }
 0x320   :  { %321 = vrot.lane.b32.xlu2 %v1392_v23, %s1671_s3 }
 0x321   :  { %v1394_v25 = vpop.eup %1393 }
 0x322   :  { %v316_v26 = vmul.f32 0.5, %v1394_v25 }
 0x324   :  { %v317_v27 = vadd.f32 0.5, %v316_v26 }
 0x326   :  { %v319_v31 = vmul.f32 0.0, %v317_v27 }
 0x37a   :  { %v322_v28 = vpop.permute.xlu2 %321 }
 0x37b   :  { %v324_v30 = vmul.f32 %v322_v28, %v317_v27 }
 0x37d   :  { %326 = vrot.lane.b32.xlu2 %v324_v30, %s1678_s2 }
 0x3d7   :  { %v327_v32 = vpop.permute.xlu2 %326 }
 0x3d8   :  { %v1879_v33 = vadd.f32 %v327_v32, %v319_v31 }
 0x3da   :  { %1395 = vtanh.f32 %v1879_v33 }
 0x3e0   :  { %v1396_v34 = vpop.eup %1395 }
 0x3e1   :  { %332 = vrot.lane.b32.xlu0 %v1396_v34, %s1671_s3 }
 0x453   :  { %v333_v35 = vpop.permute.xlu0 %332 }
 0x454   :  { %v335_v36 = vmul.f32 %v333_v35, %v317_v27 }
 0x456   :  { %341 = vrot.lane.b32.xlu2 %v335_v36, %s1671_s3 }
 0x4b0   :  { %v342_v40 = vpop.permute.xlu2 %341 }
 0x4b1   :  { %v344_v41 = vsel %vm296_vm2, %v338_v37, %v342_v40 }
 0x4b2   :  { %v345_v46 = vpack.c.bf16 %v344_v41, %v344_v41 }
 0x4b4   :  { %1310 = vmatmul.msk.bf16.vlgmr.msrb.gmra.mxu0 %vm222_vm3, %v345_v46  ;;  %1311 = vmatmul.msk.bf16.vlgmr.msrb.gmra.mxu3 %vm222_vm3, %v345_v46 }
 0x4b5   :  { %635 = vmatpush.bf16.msrb.mxu0 %v1827_v63  ;;  %682 = vmatpush.bf16.msrb.mxu3 %v1771_v3 }
 0x4b9   :  { %636 = vmatpush.bf16.msrb.mxu0 %v1834_v4  ;;  %683 = vmatpush.bf16.msrb.mxu3 %v1780_v9 }
 0x4bd   :  { %684 = vmatpush.bf16.msrb.mxu3 %v1784_v12 }
 0x4c1   :  { %685 = vmatpush.bf16.msrb.mxu3 %v1788_v15 }
 0x531   :  { %v358_v47 = vpop.f32.mrf.mxu0 }
 0x532   :  { %v379_v48 = vadd.f32 %v1798_v29, %v358_v47 }
 0x534   :  { %1397 = vtanh.f32 %v379_v48  ;;  %v380_v53 = vmul.f32 0.5, %v379_v48 }
 0x536   :  { %1399 = vtanh.f32 %v380_v53 }
 0x537   :  { %v371_v49 = vpop.f32.mrf.mxu3 }
 0x539   :  { %v360_v50 = vpop.f32.mrf.mxu0 }
 0x53a   :  { %v1398_v51 = vpop.eup %1397 }
 0x53b   :  { %387 = vrot.lane.b32.xlu0 %v1398_v51, %s1671_s3 }
 0x53c   :  { %v1400_v54 = vpop.eup %1399 }
 0x53d   :  { %v382_v55 = vmul.f32 0.5, %v1400_v54 }
 0x53f   :  { %v373_v52 = vpop.f32.mrf.mxu3  ;;  %v383_v57 = vadd.f32 0.5, %v382_v55 }
 0x541   :  { %v385_v60 = vmul.f32 %v383_v57, %v1821_v56 }
 0x5ad   :  { %v388_v58 = vpop.permute.xlu0 %387 }
 0x5ae   :  { %v390_v59 = vmul.f32 %v388_v58, %v383_v57 }
 0x5b0   :  { %392 = vrot.lane.b32.xlu1 %v390_v59, %s1678_s2 }
 0x622   :  { %v393_v62 = vpop.permute.xlu1 %392 }
 0x623   :  { %v1897_v29 = vadd.f32 %v393_v62, %v385_v60 }
 0x625   :  { %1401 = vtanh.f32 %v1897_v29 }
 0x62b   :  { %v1402_v1 = vpop.eup %1401 }
 0x62c   :  { %398 = vrot.lane.b32.xlu2 %v1402_v1, %s1671_s3 }
 0x686   :  { %v399_v2 = vpop.permute.xlu2 %398 }
 0x687   :  { %v401_v6 = vmul.f32 %v399_v2, %v383_v57 }
 0x689   :  { %v402_v7 = vpack.c.bf16 %v401_v6, %v401_v6 }
 0x68b   :  { %404 = vrot.lane.b32.xlu0 %v402_v7, %s1678_s2 }
 0x6fd   :  { %v405_v10 = vpop.permute.xlu0 %404 }
 0x6fe   :  { %1312 = vmatmul.msk.bf16.vlgmr.msrb.gmra.mxu1 %vm296_vm2, %v405_v10 }
 0x6ff   :  { %695 = vmatpush.bf16.msrb.mxu1 %v1825_v61 }
 0x703   :  { %696 = vmatpush.bf16.msrb.mxu1 %v1830_v0 }
 0x707   :  { %697 = vmatpush.bf16.msrb.mxu1 %v1838_v5 }
 0x70b   :  { %698 = vmatpush.bf16.msrb.mxu1 %v1846_v8 }
 0x77b   :  { %v418_v56 = vpop.f32.mrf.mxu1 }
 0x77c   :  { %v419_v11 = vadd.f32 %v418_v56, %v371_v49 }
 0x77e   :  { %v422_v13 = vadd.f32 %v1874_v18, %v419_v11 }
 0x780   :  { %1403 = vtanh.f32 %v422_v13  ;;  %v423_v17 = vmul.f32 0.5, %v422_v13 }
 0x782   :  { %1405 = vtanh.f32 %v423_v17 }
 0x783   :  { %v420_v14 = vpop.f32.mrf.mxu1 }
 0x786   :  { %v1404_v16 = vpop.eup %1403 }
 0x787   :  { %430 = vrot.lane.b32.xlu1 %v1404_v16, %s1671_s3 }
 0x788   :  { %v1406_v19 = vpop.eup %1405 }
 0x789   :  { %v425_v20 = vmul.f32 0.5, %v1406_v19 }
 0x78b   :  { %v426_v21 = vadd.f32 0.5, %v425_v20 }
 0x78d   :  { %v428_v24 = vmul.f32 %v426_v21, %v1879_v33 }
 0x78f   :  { %446 = vrot.lane.b32.xlu1 %v401_v6, %s1678_s2 }
 0x7f9   :  { %v431_v22 = vpop.permute.xlu1 %430 }
 0x7fa   :  { %v433_v23 = vmul.f32 %v431_v22, %v426_v21 }
 0x7fc   :  { %435 = vrot.lane.b32.xlu2 %v433_v23, %s1678_s2 }
 0x801   :  { %v447_v31 = vpop.permute.xlu1 %446 }
 0x856   :  { %v436_v25 = vpop.permute.xlu2 %435 }
 0x857   :  { %v1912_v26 = vadd.f32 %v436_v25, %v428_v24 }
 0x859   :  { %1407 = vtanh.f32 %v1912_v26 }
 0x85f   :  { %v1408_v27 = vpop.eup %1407 }
 0x860   :  { %441 = vrot.lane.b32.xlu0 %v1408_v27, %s1671_s3 }
 0x8d2   :  { %v442_v28 = vpop.permute.xlu0 %441 }
 0x8d3   :  { %v444_v30 = vmul.f32 %v442_v28, %v426_v21 }
 0x8d5   :  { %450 = vrot.lane.b32.xlu2 %v444_v30, %s1671_s3 }
 0x92f   :  { %v451_v32 = vpop.permute.xlu2 %450 }
 0x930   :  { %v453_v34 = vsel %vm296_vm2, %v447_v31, %v451_v32 }
 0x931   :  { %v454_v35 = vpack.c.bf16 %v453_v34, %v453_v34 }
 0x933   :  { %1313 = vmatmul.msk.bf16.vlgmr.msrb.gmra.mxu2 %vm222_vm3, %v454_v35  ;;  %1314 = vmatmul.msk.bf16.vlgmr.msra.gmra.mxu0 %vm222_vm3, %v454_v35 }
 0x934   :  { %745 = vmatpush.bf16.msrb.mxu2 %v1827_v63  ;;  %792 = vmatpush.bf16.msra.mxu0 %v1771_v3 }
 0x938   :  { %746 = vmatpush.bf16.msrb.mxu2 %v1834_v4  ;;  %793 = vmatpush.bf16.msra.mxu0 %v1780_v9 }
 0x93c   :  { %794 = vmatpush.bf16.msra.mxu0 %v1784_v12 }
 0x940   :  { %795 = vmatpush.bf16.msra.mxu0 %v1788_v15 }
 0x9b0   :  { %v480_v33 = vpop.f32.mrf.mxu0 }
 0x9b6   :  { %v467_v36 = vpop.f32.mrf.mxu2 }
 0x9b7   :  { %v489_v37 = vadd.f32 %v1802_v38, %v467_v36 }
 0x9b8   :  { %v482_v40 = vpop.f32.mrf.mxu0 }
 0x9b9   :  { %1409 = vtanh.f32 %v489_v37  ;;  %v490_v47 = vmul.f32 0.5, %v489_v37 }
 0x9bb   :  { %1411 = vtanh.f32 %v490_v47 }
 0x9be   :  { %v469_v41 = vpop.f32.mrf.mxu2 }
 0x9bf   :  { %v1410_v46 = vpop.eup %1409 }
 0x9c0   :  { %497 = vrot.lane.b32.xlu0 %v1410_v46, %s1671_s3 }
 0x9c1   :  { %v1412_v48 = vpop.eup %1411 }
 0x9c2   :  { %v492_v49 = vmul.f32 0.5, %v1412_v48 }
 0x9c4   :  { %v493_v50 = vadd.f32 0.5, %v492_v49 }
 0x9c6   :  { %v495_v53 = vmul.f32 %v493_v50, %v1897_v29 }
 0xa32   :  { %v498_v51 = vpop.permute.xlu0 %497 }
 0xa33   :  { %v500_v52 = vmul.f32 %v498_v51, %v493_v50 }
 0xa35   :  { %502 = vrot.lane.b32.xlu1 %v500_v52, %s1678_s2 }
 0xaa7   :  { %v503_v54 = vpop.permute.xlu1 %502 }
 0xaa8   :  { %v1930_v55 = vadd.f32 %v503_v54, %v495_v53 }
 0xaaa   :  { %1413 = vtanh.f32 %v1930_v55 }
 0xab0   :  { %v1414_v38 = vpop.eup %1413 }
 0xab1   :  { %508 = vrot.lane.b32.xlu2 %v1414_v38, %s1671_s3 }
 0xb0b   :  { %v509_v57 = vpop.permute.xlu2 %508 }
 0xb0c   :  { %v511_v58 = vmul.f32 %v509_v57, %v493_v50 }
 0xb0e   :  { %v512_v59 = vpack.c.bf16 %v511_v58, %v511_v58 }
 0xb10   :  { %514 = vrot.lane.b32.xlu0 %v512_v59, %s1678_s2 }
 0xb82   :  { %v515_v60 = vpop.permute.xlu0 %514 }
 0xb83   :  { %1315 = vmatmul.msk.bf16.vlgmr.msra.gmra.mxu3 %vm296_vm2, %v515_v60 }
 0xb84   :  { %805 = vmatpush.bf16.msra.mxu3 %v1825_v61 }
 0xb88   :  { %806 = vmatpush.bf16.msra.mxu3 %v1830_v0 }
 0xb8c   :  { %807 = vmatpush.bf16.msra.mxu3 %v1838_v5 }
 0xb90   :  { %808 = vmatpush.bf16.msra.mxu3 %v1846_v8 }
 0xc06   :  { %v528_v62 = vpop.f32.mrf.mxu3 }
 0xc07   :  { %v529_v29 = vadd.f32 %v528_v62, %v480_v33 }
 0xc09   :  { %v532_v1 = vadd.f32 %v1874_v18, %v529_v29 }
 0xc0b   :  { %1415 = vtanh.f32 %v532_v1  ;;  %v533_v7 = vmul.f32 0.5, %v532_v1 }
 0xc0d   :  { %1417 = vtanh.f32 %v533_v7 }
 0xc0e   :  { %v530_v2 = vpop.f32.mrf.mxu3 }
 0xc11   :  { %v1416_v6 = vpop.eup %1415 }
 0xc12   :  { %540 = vrot.lane.b32.xlu1 %v1416_v6, %s1671_s3 }
 0xc13   :  { %v1418_v10 = vpop.eup %1417 }
 0xc14   :  { %v535_v56 = vmul.f32 0.5, %v1418_v10 }
 0xc16   :  { %v536_v11 = vadd.f32 0.5, %v535_v56 }
 0xc18   :  { %v538_v16 = vmul.f32 %v536_v11, %v1912_v26 }
 0xc1a   :  { %556 = vrot.lane.b32.xlu1 %v511_v58, %s1678_s2 }
 0xc84   :  { %v541_v13 = vpop.permute.xlu1 %540 }
 0xc85   :  { %v543_v14 = vmul.f32 %v541_v13, %v536_v11 }
 0xc87   :  { %545 = vrot.lane.b32.xlu2 %v543_v14, %s1678_s2 }
 0xc8c   :  { %v557_v23 = vpop.permute.xlu1 %556 }
 0xce1   :  { %v546_v17 = vpop.permute.xlu2 %545 }
 0xce2   :  { %v1945_v19 = vadd.f32 %v546_v17, %v538_v16 }
 0xce4   :  { %1419 = vtanh.f32 %v1945_v19 }
 0xcea   :  { %v1420_v20 = vpop.eup %1419 }
 0xceb   :  { %551 = vrot.lane.b32.xlu0 %v1420_v20, %s1671_s3 }
 0xd5d   :  { %v552_v21 = vpop.permute.xlu0 %551 }
 0xd5e   :  { %v554_v22 = vmul.f32 %v552_v21, %v536_v11 }
 0xd60   :  { %560 = vrot.lane.b32.xlu2 %v554_v22, %s1671_s3 }
 0xdba   :  { %v561_v24 = vpop.permute.xlu2 %560 }
 0xdbb   :  { %v563_v25 = vsel %vm296_vm2, %v557_v23, %v561_v24 }
 0xdbc   :  { %v564_v27 = vpack.c.bf16 %v563_v25, %v563_v25 }
 0xdbe   :  { %1316 = vmatmul.msk.bf16.vlgmr.msra.gmra.mxu1 %vm222_vm3, %v564_v27  ;;  %1317 = vmatmul.msk.bf16.vlgmr.msra.gmra.mxu2 %vm222_vm3, %v564_v27 }
 0xdbf   :  { %855 = vmatpush.bf16.msra.mxu1 %v1827_v63  ;;  %902 = vmatpush.bf16.msra.mxu2 %v1771_v3 }
 0xdc3   :  { %856 = vmatpush.bf16.msra.mxu1 %v1834_v4  ;;  %903 = vmatpush.bf16.msra.mxu2 %v1780_v9 }
 0xdc7   :  { %904 = vmatpush.bf16.msra.mxu2 %v1784_v12 }
 0xdcb   :  { %905 = vmatpush.bf16.msra.mxu2 %v1788_v15 }
 0xe3b   :  { %v577_v26 = vpop.f32.mrf.mxu1 }
 0xe3c   :  { %v599_v28 = vadd.f32 %v1805_v39, %v577_v26 }
 0xe3e   :  { %1421 = vtanh.f32 %v599_v28  ;;  %v600_v35 = vmul.f32 0.5, %v599_v28 }
 0xe40   :  { %1423 = vtanh.f32 %v600_v35 }
 0xe41   :  { %v590_v30 = vpop.f32.mrf.mxu2 }
 0xe43   :  { %v579_v31 = vpop.f32.mrf.mxu1 }
 0xe44   :  { %v1422_v32 = vpop.eup %1421 }
 0xe45   :  { %607 = vrot.lane.b32.xlu0 %v1422_v32, %s1671_s3 }
 0xe46   :  { %v1424_v33 = vpop.eup %1423 }
 0xe47   :  { %v602_v36 = vmul.f32 0.5, %v1424_v33 }
 0xe49   :  { %v592_v34 = vpop.f32.mrf.mxu2  ;;  %v603_v37 = vadd.f32 0.5, %v602_v36 }
 0xe4b   :  { %v605_v46 = vmul.f32 %v603_v37, %v1930_v55 }
 0xeb7   :  { %v608_v40 = vpop.permute.xlu0 %607 }
 0xeb8   :  { %v610_v41 = vmul.f32 %v608_v40, %v603_v37 }
 0xeba   :  { %612 = vrot.lane.b32.xlu1 %v610_v41, %s1678_s2 }
 0xf2c   :  { %v613_v47 = vpop.permute.xlu1 %612 }
 0xf2d   :  { %v1963_v39 = vadd.f32 %v613_v47, %v605_v46 }
 0xf2f   :  { %1425 = vtanh.f32 %v1963_v39 }
 0xf35   :  { %v1426_v48 = vpop.eup %1425 }
 0xf36   :  { %618 = vrot.lane.b32.xlu2 %v1426_v48, %s1671_s3 }
 0xf90   :  { %v619_v49 = vpop.permute.xlu2 %618 }
 0xf91   :  { %v621_v50 = vmul.f32 %v619_v49, %v603_v37 }
 0xf93   :  { %v622_v51 = vpack.c.bf16 %v621_v50, %v621_v50 }
 0xf95   :  { %624 = vrot.lane.b32.xlu0 %v622_v51, %s1678_s2 }
0x1007   :  { %v625_v52 = vpop.permute.xlu0 %624 }
0x1008   :  { %1318 = vmatmul.msk.bf16.vlgmr.msrb.gmra.mxu0 %vm296_vm2, %v625_v52 }
0x1009   :  { %915 = vmatpush.bf16.msrb.mxu0 %v1825_v61 }
0x100d   :  { %916 = vmatpush.bf16.msrb.mxu0 %v1830_v0 }
0x1011   :  { %917 = vmatpush.bf16.msrb.mxu0 %v1838_v5 }
0x1015   :  { %918 = vmatpush.bf16.msrb.mxu0 %v1846_v8 }
0x1085   :  { %v638_v53 = vpop.f32.mrf.mxu0 }
0x1086   :  { %v639_v54 = vadd.f32 %v638_v53, %v590_v30 }
0x1088   :  { %v642_v55 = vadd.f32 %v1874_v18, %v639_v54 }
0x108a   :  { %1427 = vtanh.f32 %v642_v55  ;;  %v643_v58 = vmul.f32 0.5, %v642_v55 }
0x108c   :  { %1429 = vtanh.f32 %v643_v58 }
0x108d   :  { %v640_v38 = vpop.f32.mrf.mxu0 }
0x1090   :  { %v1428_v57 = vpop.eup %1427 }
0x1091   :  { %650 = vrot.lane.b32.xlu1 %v1428_v57, %s1671_s3 }
0x1092   :  { %v1430_v59 = vpop.eup %1429 }
0x1093   :  { %v645_v60 = vmul.f32 0.5, %v1430_v59 }
0x1095   :  { %v646_v62 = vadd.f32 0.5, %v645_v60 }
0x1097   :  { %v648_v2 = vmul.f32 %v646_v62, %v1945_v19 }
0x1099   :  { %666 = vrot.lane.b32.xlu1 %v621_v50, %s1678_s2 }
0x1103   :  { %v651_v29 = vpop.permute.xlu1 %650 }
0x1104   :  { %v653_v1 = vmul.f32 %v651_v29, %v646_v62 }
0x1106   :  { %655 = vrot.lane.b32.xlu2 %v653_v1, %s1678_s2 }
0x110b   :  { %v667_v13 = vpop.permute.xlu1 %666 }
0x1160   :  { %v656_v6 = vpop.permute.xlu2 %655 }
0x1161   :  { %v1978_v7 = vadd.f32 %v656_v6, %v648_v2 }
0x1163   :  { %1431 = vtanh.f32 %v1978_v7 }
0x1169   :  { %v1432_v10 = vpop.eup %1431 }
0x116a   :  { %661 = vrot.lane.b32.xlu0 %v1432_v10, %s1671_s3 }
0x11dc   :  { %v662_v56 = vpop.permute.xlu0 %661 }
0x11dd   :  { %v664_v11 = vmul.f32 %v662_v56, %v646_v62 }
0x11df   :  { %670 = vrot.lane.b32.xlu2 %v664_v11, %s1671_s3 }
0x1239   :  { %v671_v14 = vpop.permute.xlu2 %670 }
0x123a   :  { %v673_v16 = vsel %vm296_vm2, %v667_v13, %v671_v14 }
0x123b   :  { %v674_v17 = vpack.c.bf16 %v673_v16, %v673_v16 }
0x123d   :  { %1319 = vmatmul.msk.bf16.vlgmr.msrb.gmra.mxu3 %vm222_vm3, %v674_v17  ;;  %1320 = vmatmul.msk.bf16.vlgmr.msrb.gmra.mxu1 %vm222_vm3, %v674_v17 }
0x123e   :  { %965 = vmatpush.bf16.msrb.mxu3 %v1827_v63  ;;  %1012 = vmatpush.bf16.msrb.mxu1 %v1771_v3 }
0x1242   :  { %966 = vmatpush.bf16.msrb.mxu3 %v1834_v4  ;;  %1013 = vmatpush.bf16.msrb.mxu1 %v1780_v9 }
0x1246   :  { %1014 = vmatpush.bf16.msrb.mxu1 %v1784_v12 }
0x124a   :  { %1015 = vmatpush.bf16.msrb.mxu1 %v1788_v15 }
0x12ba   :  { %v700_v19 = vpop.f32.mrf.mxu1 }
0x12c0   :  { %v687_v20 = vpop.f32.mrf.mxu3 }
0x12c1   :  { %v709_v21 = vadd.f32 %v1808_v42, %v687_v20 }
0x12c2   :  { %v702_v22 = vpop.f32.mrf.mxu1 }
0x12c3   :  { %1433 = vtanh.f32 %v709_v21  ;;  %v710_v25 = vmul.f32 0.5, %v709_v21 }
0x12c5   :  { %1435 = vtanh.f32 %v710_v25 }
0x12c8   :  { %v689_v23 = vpop.f32.mrf.mxu3 }
0x12c9   :  { %v1434_v24 = vpop.eup %1433 }
0x12ca   :  { %717 = vrot.lane.b32.xlu0 %v1434_v24, %s1671_s3 }
0x12cb   :  { %v1436_v3 = vpop.eup %1435 }
0x12cc   :  { %v712_v27 = vmul.f32 0.5, %v1436_v3 }
0x12ce   :  { %v713_v26 = vadd.f32 0.5, %v712_v27 }
0x12d0   :  { %v715_v12 = vmul.f32 %v713_v26, %v1963_v39 }
0x133c   :  { %v718_v9 = vpop.permute.xlu0 %717 }
0x133d   :  { %v720_v28 = vmul.f32 %v718_v9, %v713_v26 }
0x133f   :  { %722 = vrot.lane.b32.xlu1 %v720_v28, %s1678_s2 }
0x13b1   :  { %v723_v15 = vpop.permute.xlu1 %722 }
0x13b2   :  { %v1996_v30 = vadd.f32 %v723_v15, %v715_v12 }
0x13b4   :  { %1437 = vtanh.f32 %v1996_v30 }
0x13ba   :  { %v1438_v42 = vpop.eup %1437 }
0x13bb   :  { %728 = vrot.lane.b32.xlu2 %v1438_v42, %s1671_s3 }
0x1415   :  { %v729_v31 = vpop.permute.xlu2 %728 }
0x1416   :  { %v731_v32 = vmul.f32 %v729_v31, %v713_v26 }
0x1418   :  { %v732_v34 = vpack.c.bf16 %v731_v32, %v731_v32 }
0x141a   :  { %734 = vrot.lane.b32.xlu0 %v732_v34, %s1678_s2 }
0x148c   :  { %v735_v35 = vpop.permute.xlu0 %734 }
0x148d   :  { %1321 = vmatmul.msk.bf16.vlgmr.msrb.gmra.mxu2 %vm296_vm2, %v735_v35 }
0x148e   :  { %1025 = vmatpush.bf16.msrb.mxu2 %v1825_v61 }
0x1492   :  { %1026 = vmatpush.bf16.msrb.mxu2 %v1830_v0 }
0x1496   :  { %1027 = vmatpush.bf16.msrb.mxu2 %v1838_v5 }
0x149a   :  { %1028 = vmatpush.bf16.msrb.mxu2 %v1846_v8 }
0x1510   :  { %v748_v33 = vpop.f32.mrf.mxu2 }
0x1511   :  { %v749_v36 = vadd.f32 %v748_v33, %v700_v19 }
0x1513   :  { %v752_v37 = vadd.f32 %v1874_v18, %v749_v36 }
0x1515   :  { %1439 = vtanh.f32 %v752_v37  ;;  %v753_v46 = vmul.f32 0.5, %v752_v37 }
0x1517   :  { %1441 = vtanh.f32 %v753_v46 }
0x1518   :  { %v750_v40 = vpop.f32.mrf.mxu2 }
0x151b   :  { %v1440_v41 = vpop.eup %1439 }
0x151c   :  { %760 = vrot.lane.b32.xlu1 %v1440_v41, %s1671_s3 }
0x151d   :  { %v1442_v61 = vpop.eup %1441 }
0x151e   :  { %v755_v47 = vmul.f32 0.5, %v1442_v61 }
0x1520   :  { %v756_v0 = vadd.f32 0.5, %v755_v47 }
0x1522   :  { %v758_v8 = vmul.f32 %v756_v0, %v1978_v7 }
0x1524   :  { %776 = vrot.lane.b32.xlu1 %v731_v32, %s1678_s2 }
0x158e   :  { %v761_v39 = vpop.permute.xlu1 %760 }
0x158f   :  { %v763_v5 = vmul.f32 %v761_v39, %v756_v0 }
0x1591   :  { %765 = vrot.lane.b32.xlu2 %v763_v5, %s1678_s2 }
0x1596   :  { %v777_v53 = vpop.permute.xlu1 %776 }
0x15eb   :  { %v766_v48 = vpop.permute.xlu2 %765 }
0x15ec   :  { %v768_v49 = vadd.f32 %v766_v48, %v758_v8 }
0x15ee   :  { %1443 = vtanh.f32 %v768_v49 }
0x15f4   :  { %v1444_v50 = vpop.eup %1443 }
0x15f5   :  { %771 = vrot.lane.b32.xlu0 %v1444_v50, %s1671_s3 }
0x1667   :  { %v772_v51 = vpop.permute.xlu0 %771 }
0x1668   :  { %v774_v52 = vmul.f32 %v772_v51, %v756_v0 }
0x166a   :  { %780 = vrot.lane.b32.xlu2 %v774_v52, %s1671_s3 }
0x16c4   :  { %v781_v54 = vpop.permute.xlu2 %780 }
0x16c5   :  { %v783_v55 = vsel %vm296_vm2, %v777_v53, %v781_v54 }
0x16c6   :  { %v784_v38 = vpack.c.bf16 %v783_v55, %v783_v55 }
0x16c8   :  { %1322 = vmatmul.msk.bf16.vlgmr.msra.gmra.mxu0 %vm222_vm3, %v784_v38  ;;  %1323 = vmatmul.msk.bf16.vlgmr.msra.gmra.mxu3 %vm222_vm3, %v784_v38 }
0x16c9   :  { %1075 = vmatpush.bf16.msra.mxu0 %v1827_v63 }
0x16cd   :  { %1076 = vmatpush.bf16.msra.mxu0 %v1834_v4 }
0x1745   :  { %v797_v57 = vpop.f32.mrf.mxu0 }
0x1746   :  { %v819_v58 = vadd.f32 %v1811_v43, %v797_v57 }
0x1748   :  { %1445 = vtanh.f32 %v819_v58  ;;  %v820_v1 = vmul.f32 0.5, %v819_v58 }
0x174a   :  { %1447 = vtanh.f32 %v820_v1 }
0x174b   :  { %v810_v59 = vpop.f32.mrf.mxu3 }
0x174d   :  { %v799_v60 = vpop.f32.mrf.mxu0 }
0x174e   :  { %v1446_v62 = vpop.eup %1445 }
0x174f   :  { %827 = vrot.lane.b32.xlu0 %v1446_v62, %s1671_s3 }
0x1750   :  { %v1448_v2 = vpop.eup %1447 }
0x1751   :  { %v822_v6 = vmul.f32 0.5, %v1448_v2 }
0x1753   :  { %v812_v29 = vpop.f32.mrf.mxu3  ;;  %v823_v7 = vadd.f32 0.5, %v822_v6 }
0x1755   :  { %v825_v63 = vmul.f32 %v823_v7, %v1996_v30 }
0x17c1   :  { %v828_v10 = vpop.permute.xlu0 %827 }
0x17c2   :  { %v830_v56 = vmul.f32 %v828_v10, %v823_v7 }
0x17c4   :  { %832 = vrot.lane.b32.xlu1 %v830_v56, %s1678_s2 }
0x1836   :  { %v833_v4 = vpop.permute.xlu1 %832 }
0x1837   :  { %v835_v43 = vadd.f32 %v833_v4, %v825_v63 }
0x1839   :  { %1449 = vtanh.f32 %v835_v43 }
0x183f   :  { %v1450_v11 = vpop.eup %1449 }
0x1840   :  { %838 = vrot.lane.b32.xlu2 %v1450_v11, %s1671_s3 }
0x189a   :  { %v839_v13 = vpop.permute.xlu2 %838 }
0x189b   :  { %v841_v14 = vmul.f32 %v839_v13, %v823_v7 }
0x189d   :  { %v842_v16 = vpack.c.bf16 %v841_v14, %v841_v14 }
0x189f   :  { %844 = vrot.lane.b32.xlu0 %v842_v16, %s1678_s2 }
0x1911   :  { %v845_v17 = vpop.permute.xlu0 %844 }
0x1912   :  { %1324 = vmatmul.msk.bf16.vlgmr.msra.gmra.mxu1 %vm296_vm2, %v845_v17 }
0x198f   :  { %v858_v19 = vpop.f32.mrf.mxu1 }
0x1990   :  { %v859_v20 = vadd.f32 %v858_v19, %v810_v59 }
0x1992   :  { %v862_v21 = vadd.f32 %v1874_v18, %v859_v20 }
0x1994   :  { %1451 = vtanh.f32 %v862_v21  ;;  %v863_v24 = vmul.f32 0.5, %v862_v21 }
0x1996   :  { %1453 = vtanh.f32 %v863_v24 }
0x1997   :  { %v860_v22 = vpop.f32.mrf.mxu1 }
0x199a   :  { %v1452_v23 = vpop.eup %1451 }
0x199b   :  { %870 = vrot.lane.b32.xlu1 %v1452_v23, %s1671_s3 }
0x199c   :  { %v1454_v25 = vpop.eup %1453 }
0x199d   :  { %v865_v3 = vmul.f32 0.5, %v1454_v25 }
0x199f   :  { %v866_v27 = vadd.f32 0.5, %v865_v3 }
0x19a1   :  { %v868_v28 = vmul.f32 %v866_v27, %v768_v49 }
0x19a3   :  { %886 = vrot.lane.b32.xlu1 %v841_v14, %s1678_s2 }
0x1a0d   :  { %v871_v26 = vpop.permute.xlu1 %870 }
0x1a0e   :  { %v873_v9 = vmul.f32 %v871_v26, %v866_v27 }
0x1a10   :  { %875 = vrot.lane.b32.xlu2 %v873_v9, %s1678_s2 }
0x1a15   :  { %v887_v32 = vpop.permute.xlu1 %886 }
0x1a6a   :  { %v876_v12 = vpop.permute.xlu2 %875 }
0x1a6b   :  { %v878_v15 = vadd.f32 %v876_v12, %v868_v28 }
0x1a6d   :  { %1455 = vtanh.f32 %v878_v15 }
0x1a73   :  { %v1456_v30 = vpop.eup %1455 }
0x1a74   :  { %881 = vrot.lane.b32.xlu0 %v1456_v30, %s1671_s3 }
0x1ae6   :  { %v882_v42 = vpop.permute.xlu0 %881 }
0x1ae7   :  { %v884_v31 = vmul.f32 %v882_v42, %v866_v27 }
0x1ae9   :  { %890 = vrot.lane.b32.xlu2 %v884_v31, %s1671_s3 }
0x1b43   :  { %v891_v34 = vpop.permute.xlu2 %890 }
0x1b44   :  { %v893_v35 = vsel %vm296_vm2, %v887_v32, %v891_v34 }
0x1b45   :  { %v894_v33 = vpack.c.bf16 %v893_v35, %v893_v35 }
0x1b47   :  { %1325 = vmatmul.msk.bf16.vlgmr.msra.gmra.mxu2 %vm222_vm3, %v894_v33  ;;  %1326 = vmatmul.msk.bf16.vlgmr.msrb.gmra.mxu0 %vm222_vm3, %v894_v33 }
0x1bc4   :  { %v920_v36 = vpop.f32.mrf.mxu0 }
0x1bca   :  { %v907_v37 = vpop.f32.mrf.mxu2 }
0x1bcb   :  { %v929_v40 = vadd.f32 %v1814_v44, %v907_v37 }
0x1bcc   :  { %v922_v41 = vpop.f32.mrf.mxu0 }
0x1bcd   :  { %1457 = vtanh.f32 %v929_v40  ;;  %v930_v47 = vmul.f32 0.5, %v929_v40 }
0x1bcf   :  { %1459 = vtanh.f32 %v930_v47 }
0x1bd2   :  { %v909_v46 = vpop.f32.mrf.mxu2 }
0x1bd3   :  { %v1458_v61 = vpop.eup %1457 }
0x1bd4   :  { %937 = vrot.lane.b32.xlu0 %v1458_v61, %s1671_s3 }
0x1bd5   :  { %v1460_v0 = vpop.eup %1459 }
0x1bd6   :  { %v932_v39 = vmul.f32 0.5, %v1460_v0 }
0x1bd8   :  { %v933_v5 = vadd.f32 0.5, %v932_v39 }
0x1bda   :  { %v935_v49 = vmul.f32 %v933_v5, %v835_v43 }
0x1c46   :  { %v938_v8 = vpop.permute.xlu0 %937 }
0x1c47   :  { %v940_v48 = vmul.f32 %v938_v8, %v933_v5 }
0x1c49   :  { %942 = vrot.lane.b32.xlu1 %v940_v48, %s1678_s2 }
0x1cbb   :  { %v943_v50 = vpop.permute.xlu1 %942 }
0x1cbc   :  { %v945_v51 = vadd.f32 %v943_v50, %v935_v49 }
0x1cbe   :  { %1461 = vtanh.f32 %v945_v51 }
0x1cc4   :  { %v1462_v44 = vpop.eup %1461 }
0x1cc5   :  { %948 = vrot.lane.b32.xlu2 %v1462_v44, %s1671_s3 }
0x1d1f   :  { %v949_v52 = vpop.permute.xlu2 %948 }
0x1d20   :  { %v951_v53 = vmul.f32 %v949_v52, %v933_v5  ;;  %v1679_v52 = vmov 32.0  }
0x1d22   :  { %v952_v54 = vpack.c.bf16 %v951_v53, %v951_v53 }
0x1d24   :  { %954 = vrot.lane.b32.xlu0 %v952_v54, %s1678_s2 }
0x1d96   :  { %v955_v55 = vpop.permute.xlu0 %954 }
0x1d97   :  { %1327 = vmatmul.msk.bf16.vlgmr.msrb.gmra.mxu3 %vm296_vm2, %v955_v55 }
0x1e1a   :  { %v968_v38 = vpop.f32.mrf.mxu3 }
0x1e1b   :  { %v969_v57 = vadd.f32 %v968_v38, %v920_v36 }
0x1e1d   :  { %v972_v58 = vadd.f32 %v1874_v18, %v969_v57 }
0x1e1f   :  { %1463 = vtanh.f32 %v972_v58  ;;  %v973_v62 = vmul.f32 0.5, %v972_v58 }
0x1e21   :  { %1465 = vtanh.f32 %v973_v62 }
0x1e22   :  { %v970_v59 = vpop.f32.mrf.mxu3 }
0x1e25   :  { %v1464_v60 = vpop.eup %1463 }
0x1e26   :  { %980 = vrot.lane.b32.xlu1 %v1464_v60, %s1671_s3 }
0x1e27   :  { %v1466_v29 = vpop.eup %1465 }
0x1e28   :  { %v975_v1 = vmul.f32 0.5, %v1466_v29 }
0x1e2a   :  { %v976_v2 = vadd.f32 0.5, %v975_v1  ;;  %v1381_v1 = vld [vmem:[%s2087_s6] ss:$0 sm:$0xff] }
0x1e2c   :  { %v978_v10 = vmul.f32 %v976_v2, %v878_v15 }
0x1e2e   :  { %996 = vrot.lane.b32.xlu1 %v951_v53, %s1678_s2 }
0x1e98   :  { %v981_v6 = vpop.permute.xlu1 %980 }
0x1e99   :  { %v983_v7 = vmul.f32 %v981_v6, %v976_v2 }
0x1e9b   :  { %985 = vrot.lane.b32.xlu2 %v983_v7, %s1678_s2 }
0x1ea0   :  { %v997_v13 = vpop.permute.xlu1 %996 }
0x1ef5   :  { %v986_v56 = vpop.permute.xlu2 %985 }
0x1ef6   :  { %v988_v63 = vadd.f32 %v986_v56, %v978_v10 }
0x1ef8   :  { %1467 = vtanh.f32 %v988_v63 }
0x1efe   :  { %v1468_v4 = vpop.eup %1467 }
0x1eff   :  { %991 = vrot.lane.b32.xlu0 %v1468_v4, %s1671_s3 }
0x1f71   :  { %v992_v43 = vpop.permute.xlu0 %991 }
0x1f72   :  { %v994_v11 = vmul.f32 %v992_v43, %v976_v2  ;;  %v1382_v2 = vld [vmem:[%s2088_s7] ss:$0 sm:$0xff] }
0x1f74   :  { %1000 = vrot.lane.b32.xlu2 %v994_v11, %s1671_s3  ;;  %v1361_v11 = vld [vmem:[#allocation8 + $0x8] sm:$0xff] }
0x1f75   :  { %1194 = vmatpush.bf16.msra.mxu3 %v1361_v11 }
0x1fce   :  { %v1001_v14 = vpop.permute.xlu2 %1000 }
0x1fcf   :  { %v1003_v16 = vsel %vm296_vm2, %v997_v13, %v1001_v14 }
0x1fd0   :  { %v1004_v17 = vpack.c.bf16 %v1003_v16, %v1003_v16  ;;  %v1360_v16 = vld [vmem:[#allocation8] sm:$0xff] }
0x1fd1   :  { %1195 = vmatpush.bf16.msra.mxu3 %v1360_v16 }
0x1fd2   :  { %1328 = vmatmul.msk.bf16.vlgmr.msrb.gmra.mxu1 %vm222_vm3, %v1004_v17  ;;  %1329 = vmatmul.msk.bf16.vlgmr.msrb.gmra.mxu2 %vm222_vm3, %v1004_v17 }
0x204f   :  { %v1017_v19 = vpop.f32.mrf.mxu1 }
0x2050   :  { %v1039_v20 = vadd.f32 %v1817_v45, %v1017_v19 }
0x2052   :  { %1469 = vtanh.f32 %v1039_v20  ;;  %v1040_v25 = vmul.f32 0.5, %v1039_v20 }
0x2054   :  { %1471 = vtanh.f32 %v1040_v25 }
0x2055   :  { %v1030_v21 = vpop.f32.mrf.mxu2 }
0x2057   :  { %v1019_v22 = vpop.f32.mrf.mxu1 }
0x2058   :  { %v1470_v23 = vpop.eup %1469 }
0x2059   :  { %1047 = vrot.lane.b32.xlu0 %v1470_v23, %s1671_s3 }
0x205a   :  { %v1472_v3 = vpop.eup %1471 }
0x205b   :  { %v1042_v27 = vmul.f32 0.5, %v1472_v3 }
0x205d   :  { %v1032_v24 = vpop.f32.mrf.mxu2  ;;  %v1043_v26 = vadd.f32 0.5, %v1042_v27 }
0x205f   :  { %v1045_v12 = vmul.f32 %v1043_v26, %v945_v51 }
0x20cb   :  { %v1048_v9 = vpop.permute.xlu0 %1047 }
0x20cc   :  { %v1050_v28 = vmul.f32 %v1048_v9, %v1043_v26 }
0x20ce   :  { %1052 = vrot.lane.b32.xlu1 %v1050_v28, %s1678_s2 }
0x2140   :  { %v1053_v15 = vpop.permute.xlu1 %1052 }
0x2141   :  { %v1055_v30 = vadd.f32 %v1053_v15, %v1045_v12  ;;  %v1363_v15 = vld [vmem:[%s2091_s10 + $0x8] sm:$0xff] }
0x2142   :  { %1235 = vmatpush.bf16.msra.mxu1 %v1363_v15 }
0x2143   :  { %1473 = vtanh.f32 %v1055_v30  ;;  %v1362_v30 = vld [vmem:[%s2091_s10] sm:$0xff]  ;;  %s1251_s10 = sshll.u32 %s2093_s12, 4  ;;  %s1252_s10 = int_to_ptr.hbm [resolvable:$true] %s1251_s10 }
0x2146   :  { %1236 = vmatpush.bf16.msra.mxu1 %v1362_v30 }
0x2149   :  { %v1474_v45 = vpop.eup %1473 }
0x214a   :  { %1058 = vrot.lane.b32.xlu2 %v1474_v45, %s1671_s3  ;;  %v1383_v45 = vld [vmem:[#allocation10] ss:$0 sm:$0xff] }
0x21a4   :  { %v1059_v42 = vpop.permute.xlu2 %1058 }
0x21a5   :  { %v1061_v31 = vmul.f32 %v1059_v42, %v1043_v26 }
0x21a7   :  { %v1062_v32 = vpack.c.bf16 %v1061_v31, %v1061_v31 }
0x21a9   :  { %1064 = vrot.lane.b32.xlu0 %v1062_v32, %s1678_s2 }
0x221b   :  { %v1065_v34 = vpop.permute.xlu0 %1064 }
0x221c   :  { %1330 = vmatmul.msk.bf16.vlgmr.msra.gmra.mxu0 %vm296_vm2, %v1065_v34 }
0x2299   :  { %v1078_v35 = vpop.f32.mrf.mxu0 }
0x229a   :  { %v1079_v33 = vadd.f32 %v1078_v35, %v1030_v21 }
0x229c   :  { %v1082_v36 = vadd.f32 %v1874_v18, %v1079_v33 }
0x229e   :  { %1475 = vtanh.f32 %v1082_v36  ;;  %v1083_v41 = vmul.f32 0.5, %v1082_v36 }
0x22a0   :  { %1477 = vtanh.f32 %v1083_v41 }
0x22a1   :  { %v1080_v37 = vpop.f32.mrf.mxu0 }
0x22a4   :  { %v1476_v40 = vpop.eup %1475 }
0x22a5   :  { %1090 = vrot.lane.b32.xlu1 %v1476_v40, %s1671_s3  ;;  %v1384_v40 = vld [vmem:[#allocation11] ss:$0 sm:$0xff] }
0x22a6   :  { %v1478_v46 = vpop.eup %1477 }
0x22a7   :  { %v1085_v61 = vmul.f32 0.5, %v1478_v46 }
0x22a9   :  { %v1086_v47 = vadd.f32 0.5, %v1085_v61 }
0x22ab   :  { %v1088_v5 = vmul.f32 %v1086_v47, %v988_v63 }
0x2317   :  { %v1091_v0 = vpop.permute.xlu1 %1090 }
0x2318   :  { %v1093_v39 = vmul.f32 %v1091_v0, %v1086_v47 }
0x231a   :  { %1095 = vrot.lane.b32.xlu2 %v1093_v39, %s1678_s2 }
0x2374   :  { %v1096_v8 = vpop.permute.xlu2 %1095 }
0x2375   :  { %v1098_v48 = vadd.f32 %v1096_v8, %v1088_v5 }
0x2377   :  { %1479 = vtanh.f32 %v1098_v48 }
0x2378   :  { %1481 = vrcp.f32 %v1679_v52 }
0x237d   :  { %v1480_v49 = vpop.eup %1479 }
0x237e   :  { %1101 = vrot.lane.b32.xlu0 %v1480_v49, %s1671_s3  ;;  %v1482_v53 = vpop.eup %1481 }
0x237f   :  { %v1114_v54 = vmul.f32 32.0, %v1482_v53  ;;  %vm1118_vm5 = vweird.f32 %v1482_v53 }
0x2381   :  { %v1115_v55 = vsub.f32 1.0, %v1114_v54 }
0x2383   :  { %v1116_v38 = vmul.f32 %v1482_v53, %v1115_v55 }
0x2385   :  { %v1117_v57 = vadd.f32 %v1482_v53, %v1116_v38 }
0x2387   :  { %v1119_v58 = vsel %vm1118_vm5, %v1482_v53, %v1117_v57 }
0x23f0   :  { %v1102_v18 = vpop.permute.xlu0 %1101 }
0x23f1   :  { %v1104_v50 = vmul.f32 %v1102_v18, %v1086_v47 }
0x23f3   :  { %1106 = vrot.lane.b32.xlu1 %v1104_v50, %s1678_s2 }
0x2465   :  { %v1107_v51 = vpop.permute.xlu1 %1106 }
0x2466   :  { %v1110_v44 = vsel %vm1109_vm4, %v1107_v51, 0.0 }
0x2467   :  { %1111 = vadd.xlane.f32.xlu2 %v1110_v44 }
0x24da   :  { %v1112_v59 = vpop.xlane.xlu2 %1111 }
0x24db   :  { %v1120_v60 = vmul.f32 %v1119_v58, %v1112_v59 }
0x24dd   :  { %v1121_v62 = vsub.f32 %v1104_v50, %v1120_v60 }
0x24df   :  { %v1122_v29 = vmul.f32 %v1121_v62, %v1121_v62 }
0x24e1   :  { %1124 = vrot.lane.b32.xlu0 %v1122_v29, %s1678_s2 }
0x24e9   :  { %1146 = vrot.lane.b32.xlu0 %v1381_v1, %s1680_s20 }
0x24f1   :  { %1153 = vrot.lane.b32.xlu0 %v1382_v2, %s1680_s20 }
0x2553   :  { %v1125_v6 = vpop.permute.xlu0 %1124 }
0x2554   :  { %v1127_v7 = vsel %vm1109_vm4, %v1125_v6, 0.0 }
0x2555   :  { %1128 = vadd.xlane.f32.xlu1 %v1127_v7 }
0x255b   :  { %v1147_v14 = vpop.permute.xlu0 %1146 }
0x2563   :  { %v1154_v23 = vpop.permute.xlu0 %1153 }
0x25c8   :  { %v1129_v10 = vpop.xlane.xlu1 %1128 }
0x25c9   :  { %v1130_v56 = vmul.f32 %v1129_v10, %v1119_v58 }
0x25cb   :  { %v1131_v63 = vadd.f32 1e-05, %v1130_v56 }
0x25cd   :  { %1483 = vrsqrt.f32 %v1131_v63  ;;  %vm1138_vm7 = vweird.f32 %v1131_v63 }
0x25d3   :  { %v1484_v4 = vpop.eup %1483 }
0x25d4   :  { %v1133_v43 = vmul.f32 %v1484_v4, %v1131_v63  ;;  %vm1139_vm6 = vweird.f32 %v1484_v4 }
0x25d5   :  { %vm1140_vm8 = vmor %vm1138_vm7, %vm1139_vm6 }
0x25d6   :  { %v1134_v13 = vmul.f32 %v1484_v4, %v1133_v43 }
0x25d8   :  { %v1135_v17 = vmul.f32 0.5, %v1134_v13 }
0x25da   :  { %v1136_v19 = vsub.f32 1.5, %v1135_v17 }
0x25dc   :  { %v1137_v20 = vmul.f32 %v1484_v4, %v1136_v19 }
0x25de   :  { %v1141_v21 = vsel %vm1140_vm8, %v1484_v4, %v1137_v20 }
0x25df   :  { %v1142_v22 = vmul.f32 %v1141_v21, %v1121_v62 }
0x25e1   :  { %v1149_v24 = vmul.f32 %v1147_v14, %v1142_v22 }
0x25e3   :  { %v1156_v25 = vadd.f32 %v1154_v23, %v1149_v24 }
0x25e5   :  { %v1157_v3 = vmul.f32 0.5, %v1156_v25 }
0x25e7   :  { %1485 = vtanh.f32 %v1157_v3 }
0x25ed   :  { %v1486_v27 = vpop.eup %1485 }
0x25ee   :  { %v1159_v26 = vmul.f32 0.5, %v1486_v27 }
0x25f0   :  { %v1160_v9 = vadd.f32 0.5, %v1159_v26 }
0x25f2   :  { %v1161_v28 = vpack.c.bf16 %v1160_v9, %v1160_v9 }
0x25f4   :  { %1171 = vrot.lane.b32.xlu0 %v1161_v28, %s1678_s2 }
0x2666   :  { %v1172_v12 = vpop.permute.xlu0 %1171 }
0x2667   :  { %1339 = vmatmul.msk.bf16.vlgmr.msra.gmra.mxu3 %vm296_vm2, %v1172_v12 }
0x26ea   :  { %v1197_v42 = vpop.f32.mrf.mxu3 }
0x26eb   :  { %v1198_v31 = vadd.f32 %v1383_v45, %v1197_v42 }
0x26ed   :  { %v1201_v32 = vmul.f32 0.5, %v1198_v31 }
0x26ef   :  { %1487 = vtanh.f32 %v1201_v32 }
0x26f2   :  { %v1199_v34 = vpop.f32.mrf.mxu3 }
0x26f5   :  { %v1488_v35 = vpop.eup %1487 }
0x26f6   :  { %v1203_v33 = vmul.f32 0.5, %v1488_v35 }
0x26f8   :  { %v1204_v36 = vadd.f32 0.5, %v1203_v33 }
0x26fa   :  { %v1205_v37 = vpack.c.bf16 %v1204_v36, %v1204_v36 }
0x26fc   :  { %1348 = vmatmul.msk.bf16.vlgmr.msra.gmra.mxu1 %vm296_vm2, %v1205_v37 }
0x2779   :  { %v1238_v41 = vpop.f32.mrf.mxu1 }
0x277a   :  { %v1239_v46 = vadd.f32 %v1384_v40, %v1238_v41 }
0x277c   :  { %1243 = vst.msk [vmem:[#allocation13] sm:$0x3] %vm1242_vm9, %v1239_v46 }
0x277d   :  { %1254 = dma.vmem_to_hbm [thread:$0]  %s1250_s24, 32, %s1252_s10, [#allocation4]  }
0x2781   :  { %v1240_v61 = vpop.f32.mrf.mxu1 }
0x2782   :  { %1665 = dma.done.wait [#allocation4], 32  }
0x2783   :  { %1666 = vsyncadd [#allocation4], 4294967264 }
0x2784   :  { %1259 = vsyncpa [#allocation3], 1 }
0x2785   :  { %1260 = vsyncpa [#allocation6], 1 }
0x2786   :  { %1261 = vsyncpa [#allocation9], 1 }
0x2787   :  { %1262 = vsyncpa [#allocation12], 1 }
0x2788   :  { %1263 = vsyncpa [#allocation4], 1 }

</bundles_post_ra>
